<compile_context>
chip_gen: v7x
topology: tpu7x:2x2x1
jax: 0.10.0
libtpu: 0.0.40
codegen_flags: <defaults>
</compile_context>

<pallas_src>
import functools

import jax
import jax.numpy as jnp
import numpy as np
from jax.experimental import pallas as pl
from jax.experimental.pallas import tpu as pltpu


def _round_up(x, m):
    return ((x + m - 1) // m) * m


def _fused_lstm_kernel(x_ref, wih0_ref, wihR_ref, whh_ref, b_ref, wfc_ref, bfc_ref,
                       out_ref, seq_sc, pg_sc, *, T, BNp, H, num_layers):
    """Fused multi-layer LSTM + Linear head. Everything VMEM-resident; grid=(1,)."""
    h_last = None
    for layer in range(num_layers):                       # static Python loop over layers
        # ---- hoisted input projection for all T timesteps (off the serial chain) ----
        if layer == 0:
            seq_in = x_ref[...]                           # (T*BNp, D)
            wih = wih0_ref[...]                           # (D, 4H)
        else:
            seq_in = seq_sc[...]                          # (T*BNp, H) previous layer's hidden seq
            wih = wihR_ref[layer - 1]                     # (H, 4H)
        pg_sc[...] = (jnp.dot(seq_in, wih, preferred_element_type=jnp.float32)
                      + b_ref[layer])                     # (T*BNp, 4H) pre-gates

        whh = whh_ref[layer]                              # (H, 4H), kept resident
        write_seq = layer < num_layers - 1                # last layer's sequence is unused

        def step(t, carry, whh=whh, write_seq=write_seq):
            h, c = carry
            row = pl.multiple_of(t * BNp, BNp)
            gates = pg_sc[pl.ds(row, BNp), :] + jnp.dot(
                h, whh, preferred_element_type=jnp.float32)       # (BNp, 4H)
            sg = jax.nn.sigmoid(gates)                    # full-width EUP passes
            th = jnp.tanh(gates)
            i_g = sg[:, 0 * H:1 * H]
            f_g = sg[:, 1 * H:2 * H]
            g_g = th[:, 2 * H:3 * H]
            o_g = sg[:, 3 * H:4 * H]
            c_new = f_g * c + i_g * g_g
            h_new = o_g * jnp.tanh(c_new)
            if write_seq:
                seq_sc[pl.ds(row, BNp), :] = h_new        # hand off to next layer (stays in VMEM)
            return h_new, c_new

        h0 = jnp.zeros((BNp, H), jnp.float32)
        c0 = jnp.zeros((BNp, H), jnp.float32)
        h_last, _ = jax.lax.fori_loop(0, T, step, (h0, c0), unroll=True)

    # ---- fc head on h_n[-1]; output block (BNp, EP) is sublane-full / lane-dense ----
    out = jnp.dot(h_last, wfc_ref[...], preferred_element_type=jnp.float32) + bfc_ref[...]
    out_ref[...] = out.astype(out_ref.dtype)


def _forward_impl(x, lstm_params, fc_w, fc_b):
    """x: (B, N, L, dim_data_time). Returns (B, N, dim_emb_time), matching LSTMAggregator.forward."""
    B, N, L, D = x.shape
    BN = B * N
    T = L
    H = lstm_params[0][1].shape[1]                        # w_hh: (4H, H)
    E = fc_w.shape[0]
    num_layers = len(lstm_params)
    BNp = _round_up(BN, 8)                                # sublane-full batch
    EP = _round_up(E, 128)                                # lane-dense output store

    # --- glue: time-major, batch-padded, flat (row = t*BNp + b) layer-0 input ---
    xf = x.reshape(BN, T, D).astype(jnp.float32)
    xf = jnp.pad(xf, ((0, BNp - BN), (0, 0), (0, 0)))
    xf = jnp.transpose(xf, (1, 0, 2)).reshape(T * BNp, D)

    # --- weight prep (transposed so 4H is the lane axis everywhere) ---
    wih0_t = jnp.transpose(lstm_params[0][0])                                 # (D, 4H)
    if num_layers > 1:
        wihR_t = jnp.stack([jnp.transpose(p[0]) for p in lstm_params[1:]])    # (L-1, H, 4H)
    else:
        wihR_t = jnp.zeros((1, H, 4 * H), jnp.float32)                        # dummy, never read
    whh_t = jnp.stack([jnp.transpose(p[1]) for p in lstm_params])             # (L, H, 4H)
    bias = jnp.stack([(p[2] + p[3]).reshape(1, 4 * H) for p in lstm_params])  # (L, 1, 4H)
    wfc_t = jnp.zeros((H, EP), jnp.float32).at[:, :E].set(jnp.transpose(fc_w))
    bfc = jnp.zeros((1, EP), jnp.float32).at[:, :E].set(fc_b.reshape(1, E))

    kernel = functools.partial(_fused_lstm_kernel, T=T, BNp=BNp, H=H, num_layers=num_layers)

    out = pl.pallas_call(
        kernel,
        out_shape=jax.ShapeDtypeStruct((BNp, EP), jnp.float32),
        grid_spec=pltpu.PrefetchScalarGridSpec(
            num_scalar_prefetch=0,
            grid=(1,),
            in_specs=[
                pl.BlockSpec((T * BNp, D), lambda i: (0, 0)),           # layer-0 input (flat)
                pl.BlockSpec((D, 4 * H), lambda i: (0, 0)),             # W_ih^T layer 0
                pl.BlockSpec(wihR_t.shape, lambda i: (0, 0, 0)),        # W_ih^T layers 1..
                pl.BlockSpec((num_layers, H, 4 * H), lambda i: (0, 0, 0)),  # W_hh^T all layers
                pl.BlockSpec((num_layers, 1, 4 * H), lambda i: (0, 0, 0)),  # b_ih + b_hh
                pl.BlockSpec((H, EP), lambda i: (0, 0)),                # fc weight^T (padded)
                pl.BlockSpec((1, EP), lambda i: (0, 0)),                # fc bias (padded)
            ],
            out_specs=pl.BlockSpec((BNp, EP), lambda i: (0, 0)),
            scratch_shapes=[
                pltpu.VMEM((T * BNp, H), jnp.float32),                  # inter-layer hidden seq
                pltpu.VMEM((T * BNp, 4 * H), jnp.float32),              # hoisted pre-gates
            ],
        ),
        compiler_params=pltpu.CompilerParams(
            dimension_semantics=("arbitrary",),
            vmem_limit_bytes=32 * 1024 * 1024,                          # explicit budget (v7x-safe)
        ),
    )(xf, wih0_t, wihR_t, whh_t, bias, wfc_t, bfc)

    return out[:BN, :E].reshape(B, N, E)


lstm_aggregator_forward = jax.jit(_forward_impl)


def init_lstm_aggregator_params(key, dim_data_time, dim_emb_time, hidden, num_layers):
    """nn.LSTM / nn.Linear shaped params, U(-k, k) with k = 1/sqrt(hidden)."""
    k = 1.0 / np.sqrt(hidden)
    lstm_params = []
    for layer in range(num_layers):
        d_in = dim_data_time if layer == 0 else hidden
        key, k1, k2, k3, k4 = jax.random.split(key, 5)
        w_ih = jax.random.uniform(k1, (4 * hidden, d_in), jnp.float32, -k, k)
        w_hh = jax.random.uniform(k2, (4 * hidden, hidden), jnp.float32, -k, k)
        b_ih = jax.random.uniform(k3, (4 * hidden,), jnp.float32, -k, k)
        b_hh = jax.random.uniform(k4, (4 * hidden,), jnp.float32, -k, k)
        lstm_params.append((w_ih, w_hh, b_ih, b_hh))
    key, k5, k6 = jax.random.split(key, 3)
    fc_w = jax.random.uniform(k5, (dim_emb_time, hidden), jnp.float32, -k, k)
    fc_b = jax.random.uniform(k6, (dim_emb_time,), jnp.float32, -k, k)
    return lstm_params, fc_w, fc_b


def _reference_forward(x, lstm_params, fc_w, fc_b):
    """Pure-JAX (lax.scan) reference mirroring the PyTorch module."""
    B, N, L, D = x.shape
    BN = B * N
    seq = jnp.transpose(x.reshape(BN, L, D).astype(jnp.float32), (1, 0, 2))   # (L, BN, D)
    h_last = None
    for (w_ih, w_hh, b_ih, b_hh) in lstm_params:
        H = w_hh.shape[1]

        def step(carry, x_t, w_ih=w_ih, w_hh=w_hh, b_ih=b_ih, b_hh=b_hh, H=H):
            h, c = carry
            gates = x_t @ w_ih.T + h @ w_hh.T + b_ih + b_hh
            i = jax.nn.sigmoid(gates[:, 0:H])
            f = jax.nn.sigmoid(gates[:, H:2 * H])
            g = jnp.tanh(gates[:, 2 * H:3 * H])
            o = jax.nn.sigmoid(gates[:, 3 * H:4 * H])
            c = f * c + i * g
            h = o * jnp.tanh(c)
            return (h, c), h

        init = (jnp.zeros((BN, H), jnp.float32), jnp.zeros((BN, H), jnp.float32))
        (h_last, _), seq = jax.lax.scan(step, init, seq)
    emb = h_last @ fc_w.T + fc_b
    return emb.reshape(B, N, -1)


if __name__ == "__main__":
    # Module config: LSTMAggregator(dim_data_time=4, dim_emb_time=32, lstm_hidden_size=64, num_layers=2)
    dim_data_time, dim_emb_time = 4, 32
    lstm_hidden_size, num_layers = 64, 2
    B, N, L = 2, 4, 8                                     # (B, N, L, dim_data_time)

    key = jax.random.PRNGKey(0)
    key, kx = jax.random.split(key)
    x = jax.random.normal(kx, (B, N, L, dim_data_time), jnp.float32)

    lstm_params, fc_w, fc_b = init_lstm_aggregator_params(
        key, dim_data_time, dim_emb_time, lstm_hidden_size, num_layers)

    out = lstm_aggregator_forward(x, lstm_params, fc_w, fc_b)
    out = jax.block_until_ready(out)

    ref = _reference_forward(x, lstm_params, fc_w, fc_b)
    np.testing.assert_allclose(np.asarray(out), np.asarray(ref), atol=1e-4, rtol=1e-4)
    assert out.shape == (B, N, dim_emb_time)

    print("KERNEL_OK")
</pallas_src>

<mosaic_0001>
module attributes {stable_mosaic.version = 11 : i64} {
  func.func @_fused_lstm_kernel(%arg0: i32, %arg1: memref<64x4xf32, #tpu.memory_space<vmem>>, %arg2: memref<4x256xf32, #tpu.memory_space<vmem>>, %arg3: memref<1x64x256xf32, #tpu.memory_space<vmem>>, %arg4: memref<2x64x256xf32, #tpu.memory_space<vmem>>, %arg5: memref<2x1x256xf32, #tpu.memory_space<vmem>>, %arg6: memref<64x128xf32, #tpu.memory_space<vmem>>, %arg7: memref<1x128xf32, #tpu.memory_space<vmem>>, %arg8: memref<8x128xf32, #tpu.memory_space<vmem>>, %arg9: memref<64x64xf32, #tpu.memory_space<vmem>>, %arg10: memref<64x256xf32, #tpu.memory_space<vmem>>) attributes {dimension_semantics = [#tpu.dimension_semantics<arbitrary>], iteration_bounds = array<i64: 1>, scalar_prefetch = 0 : i64, scratch_operands = 2 : i64, tpu.core_type = #tpu.core_type<tc>, window_params = [{pipeline_mode = #tpu.pipeline_mode<synchronous>, transform_indices = @transform_0, window_bounds = array<i64: 64, 4>}, {pipeline_mode = #tpu.pipeline_mode<synchronous>, transform_indices = @transform_1, window_bounds = array<i64: 4, 256>}, {pipeline_mode = #tpu.pipeline_mode<synchronous>, transform_indices = @transform_2, window_bounds = array<i64: 1, 64, 256>}, {pipeline_mode = #tpu.pipeline_mode<synchronous>, transform_indices = @transform_3, window_bounds = array<i64: 2, 64, 256>}, {pipeline_mode = #tpu.pipeline_mode<synchronous>, transform_indices = @transform_4, window_bounds = array<i64: 2, 1, 256>}, {pipeline_mode = #tpu.pipeline_mode<synchronous>, transform_indices = @transform_5, window_bounds = array<i64: 64, 128>}, {pipeline_mode = #tpu.pipeline_mode<synchronous>, transform_indices = @transform_6, window_bounds = array<i64: 1, 128>}, {pipeline_mode = #tpu.pipeline_mode<synchronous>, transform_indices = @transform_7, window_bounds = array<i64: 8, 128>}]} {
    %c0 = arith.constant 0 : index
    %c0_0 = arith.constant 0 : index
    %0 = vector.load %arg1[%c0, %c0_0] : memref<64x4xf32, #tpu.memory_space<vmem>>, vector<64x4xf32>
    %c0_1 = arith.constant 0 : index
    %c0_2 = arith.constant 0 : index
    %1 = vector.load %arg2[%c0_1, %c0_2] : memref<4x256xf32, #tpu.memory_space<vmem>>, vector<4x256xf32>
    %cst = arith.constant dense<0.000000e+00> : vector<64x256xf32>
    %2 = tpu.matmul %0, %1, %cst {dimension_numbers = #tpu.dot_dimension_numbers<[1], [0], [0], [1], [0, 0, 1, 1], [], []>} : vector<64x4xf32>, vector<4x256xf32>, vector<64x256xf32> -> vector<64x256xf32>
    %c0_3 = arith.constant 0 : index
    %c0_4 = arith.constant 0 : index
    %c0_5 = arith.constant 0 : index
    %3 = vector.load %arg5[%c0_3, %c0_4, %c0_5] : memref<2x1x256xf32, #tpu.memory_space<vmem>>, vector<1x1x256xf32>
    %4 = vector.shape_cast %3 : vector<1x1x256xf32> to vector<1x256xf32>
    %5 = vector.broadcast %4 : vector<1x256xf32> to vector<64x256xf32>
    %6 = arith.addf %2, %5 : vector<64x256xf32>
    %c0_6 = arith.constant 0 : index
    %c0_7 = arith.constant 0 : index
    %7 = vector.load %arg10[%c0_6, %c0_7] : memref<64x256xf32, #tpu.memory_space<vmem>>, vector<64x256xf32>
    tpu.vector_store %arg10[%c0_6, %c0_7], %6 {strides = array<i32>} : memref<64x256xf32, #tpu.memory_space<vmem>>, vector<64x256xf32>,
    %c0_8 = arith.constant 0 : index
    %c0_9 = arith.constant 0 : index
    %c0_10 = arith.constant 0 : index
    %8 = vector.load %arg4[%c0_8, %c0_9, %c0_10] : memref<2x64x256xf32, #tpu.memory_space<vmem>>, vector<1x64x256xf32>
    %9 = vector.shape_cast %8 : vector<1x64x256xf32> to vector<64x256xf32>
    %cst_11 = arith.constant 0.000000e+00 : f32
    %10 = vector.broadcast %cst_11 : f32 to vector<8x64xf32>
    %cst_12 = arith.constant 0.000000e+00 : f32
    %11 = vector.broadcast %cst_12 : f32 to vector<8x64xf32>
    %c0_i32 = arith.constant 0 : i32
    %c8_i32 = arith.constant 8 : i32
    %12 = arith.muli %c0_i32, %c8_i32 : i32
    %13 = tpu.assume_multiple %12, 8 : i32
    %14 = arith.index_cast %13 : i32 to index
    %c0_13 = arith.constant 0 : index
    %15 = vector.load %arg10[%14, %c0_13] : memref<64x256xf32, #tpu.memory_space<vmem>>, vector<8x256xf32>
    %cst_14 = arith.constant dense<0.000000e+00> : vector<8x256xf32>
    %16 = tpu.matmul %10, %9, %cst_14 {dimension_numbers = #tpu.dot_dimension_numbers<[1], [0], [0], [1], [0, 0, 1, 1], [], []>} : vector<8x64xf32>, vector<64x256xf32>, vector<8x256xf32> -> vector<8x256xf32>
    %17 = arith.addf %15, %16 : vector<8x256xf32>
    %18 = arith.negf %17 : vector<8x256xf32>
    %19 = math.exp %18 : vector<8x256xf32>
    %cst_15 = arith.constant 1.000000e+00 : f32
    %20 = vector.broadcast %cst_15 : f32 to vector<8x256xf32>
    %21 = arith.addf %20, %19 : vector<8x256xf32>
    %22 = arith.divf %20, %21 : vector<8x256xf32>
    %23 = math.tanh %17 : vector<8x256xf32>
    %24 = vector.extract_strided_slice %22 {offsets = [0, 0], sizes = [8, 64], strides = [1, 1]} : vector<8x256xf32> to vector<8x64xf32>
    %25 = vector.extract_strided_slice %22 {offsets = [0, 64], sizes = [8, 64], strides = [1, 1]} : vector<8x256xf32> to vector<8x64xf32>
    %26 = vector.extract_strided_slice %23 {offsets = [0, 128], sizes = [8, 64], strides = [1, 1]} : vector<8x256xf32> to vector<8x64xf32>
    %27 = vector.extract_strided_slice %22 {offsets = [0, 192], sizes = [8, 64], strides = [1, 1]} : vector<8x256xf32> to vector<8x64xf32>
    %28 = arith.mulf %25, %11 : vector<8x64xf32>
    %29 = arith.mulf %24, %26 : vector<8x64xf32>
    %30 = arith.addf %28, %29 : vector<8x64xf32>
    %31 = math.tanh %30 : vector<8x64xf32>
    %32 = arith.mulf %27, %31 : vector<8x64xf32>
    %33 = arith.index_cast %13 : i32 to index
    %c0_16 = arith.constant 0 : index
    %34 = vector.load %arg9[%33, %c0_16] : memref<64x64xf32, #tpu.memory_space<vmem>>, vector<8x64xf32>
    tpu.vector_store %arg9[%33, %c0_16], %32 {strides = array<i32>} : memref<64x64xf32, #tpu.memory_space<vmem>>, vector<8x64xf32>,
    %c1_i32 = arith.constant 1 : i32
    %c8_i32_17 = arith.constant 8 : i32
    %35 = arith.muli %c1_i32, %c8_i32_17 : i32
    %36 = tpu.assume_multiple %35, 8 : i32
    %37 = arith.index_cast %36 : i32 to index
    %c0_18 = arith.constant 0 : index
    %38 = vector.load %arg10[%37, %c0_18] : memref<64x256xf32, #tpu.memory_space<vmem>>, vector<8x256xf32>
    %cst_19 = arith.constant dense<0.000000e+00> : vector<8x256xf32>
    %39 = tpu.matmul %32, %9, %cst_19 {dimension_numbers = #tpu.dot_dimension_numbers<[1], [0], [0], [1], [0, 0, 1, 1], [], []>} : vector<8x64xf32>, vector<64x256xf32>, vector<8x256xf32> -> vector<8x256xf32>
    %40 = arith.addf %38, %39 : vector<8x256xf32>
    %41 = arith.negf %40 : vector<8x256xf32>
    %42 = math.exp %41 : vector<8x256xf32>
    %cst_20 = arith.constant 1.000000e+00 : f32
    %43 = vector.broadcast %cst_20 : f32 to vector<8x256xf32>
    %44 = arith.addf %43, %42 : vector<8x256xf32>
    %45 = arith.divf %43, %44 : vector<8x256xf32>
    %46 = math.tanh %40 : vector<8x256xf32>
    %47 = vector.extract_strided_slice %45 {offsets = [0, 0], sizes = [8, 64], strides = [1, 1]} : vector<8x256xf32> to vector<8x64xf32>
    %48 = vector.extract_strided_slice %45 {offsets = [0, 64], sizes = [8, 64], strides = [1, 1]} : vector<8x256xf32> to vector<8x64xf32>
    %49 = vector.extract_strided_slice %46 {offsets = [0, 128], sizes = [8, 64], strides = [1, 1]} : vector<8x256xf32> to vector<8x64xf32>
    %50 = vector.extract_strided_slice %45 {offsets = [0, 192], sizes = [8, 64], strides = [1, 1]} : vector<8x256xf32> to vector<8x64xf32>
    %51 = arith.mulf %48, %30 : vector<8x64xf32>
    %52 = arith.mulf %47, %49 : vector<8x64xf32>
    %53 = arith.addf %51, %52 : vector<8x64xf32>
    %54 = math.tanh %53 : vector<8x64xf32>
    %55 = arith.mulf %50, %54 : vector<8x64xf32>
    %56 = arith.index_cast %36 : i32 to index
    %c0_21 = arith.constant 0 : index
    %57 = vector.load %arg9[%56, %c0_21] : memref<64x64xf32, #tpu.memory_space<vmem>>, vector<8x64xf32>
    tpu.vector_store %arg9[%56, %c0_21], %55 {strides = array<i32>} : memref<64x64xf32, #tpu.memory_space<vmem>>, vector<8x64xf32>,
    %c2_i32 = arith.constant 2 : i32
    %c8_i32_22 = arith.constant 8 : i32
    %58 = arith.muli %c2_i32, %c8_i32_22 : i32
    %59 = tpu.assume_multiple %58, 8 : i32
    %60 = arith.index_cast %59 : i32 to index
    %c0_23 = arith.constant 0 : index
    %61 = vector.load %arg10[%60, %c0_23] : memref<64x256xf32, #tpu.memory_space<vmem>>, vector<8x256xf32>
    %cst_24 = arith.constant dense<0.000000e+00> : vector<8x256xf32>
    %62 = tpu.matmul %55, %9, %cst_24 {dimension_numbers = #tpu.dot_dimension_numbers<[1], [0], [0], [1], [0, 0, 1, 1], [], []>} : vector<8x64xf32>, vector<64x256xf32>, vector<8x256xf32> -> vector<8x256xf32>
    %63 = arith.addf %61, %62 : vector<8x256xf32>
    %64 = arith.negf %63 : vector<8x256xf32>
    %65 = math.exp %64 : vector<8x256xf32>
    %cst_25 = arith.constant 1.000000e+00 : f32
    %66 = vector.broadcast %cst_25 : f32 to vector<8x256xf32>
    %67 = arith.addf %66, %65 : vector<8x256xf32>
    %68 = arith.divf %66, %67 : vector<8x256xf32>
    %69 = math.tanh %63 : vector<8x256xf32>
    %70 = vector.extract_strided_slice %68 {offsets = [0, 0], sizes = [8, 64], strides = [1, 1]} : vector<8x256xf32> to vector<8x64xf32>
    %71 = vector.extract_strided_slice %68 {offsets = [0, 64], sizes = [8, 64], strides = [1, 1]} : vector<8x256xf32> to vector<8x64xf32>
    %72 = vector.extract_strided_slice %69 {offsets = [0, 128], sizes = [8, 64], strides = [1, 1]} : vector<8x256xf32> to vector<8x64xf32>
    %73 = vector.extract_strided_slice %68 {offsets = [0, 192], sizes = [8, 64], strides = [1, 1]} : vector<8x256xf32> to vector<8x64xf32>
    %74 = arith.mulf %71, %53 : vector<8x64xf32>
    %75 = arith.mulf %70, %72 : vector<8x64xf32>
    %76 = arith.addf %74, %75 : vector<8x64xf32>
    %77 = math.tanh %76 : vector<8x64xf32>
    %78 = arith.mulf %73, %77 : vector<8x64xf32>
    %79 = arith.index_cast %59 : i32 to index
    %c0_26 = arith.constant 0 : index
    %80 = vector.load %arg9[%79, %c0_26] : memref<64x64xf32, #tpu.memory_space<vmem>>, vector<8x64xf32>
    tpu.vector_store %arg9[%79, %c0_26], %78 {strides = array<i32>} : memref<64x64xf32, #tpu.memory_space<vmem>>, vector<8x64xf32>,
    %c3_i32 = arith.constant 3 : i32
    %c8_i32_27 = arith.constant 8 : i32
    %81 = arith.muli %c3_i32, %c8_i32_27 : i32
    %82 = tpu.assume_multiple %81, 8 : i32
    %83 = arith.index_cast %82 : i32 to index
    %c0_28 = arith.constant 0 : index
    %84 = vector.load %arg10[%83, %c0_28] : memref<64x256xf32, #tpu.memory_space<vmem>>, vector<8x256xf32>
    %cst_29 = arith.constant dense<0.000000e+00> : vector<8x256xf32>
    %85 = tpu.matmul %78, %9, %cst_29 {dimension_numbers = #tpu.dot_dimension_numbers<[1], [0], [0], [1], [0, 0, 1, 1], [], []>} : vector<8x64xf32>, vector<64x256xf32>, vector<8x256xf32> -> vector<8x256xf32>
    %86 = arith.addf %84, %85 : vector<8x256xf32>
    %87 = arith.negf %86 : vector<8x256xf32>
    %88 = math.exp %87 : vector<8x256xf32>
    %cst_30 = arith.constant 1.000000e+00 : f32
    %89 = vector.broadcast %cst_30 : f32 to vector<8x256xf32>
    %90 = arith.addf %89, %88 : vector<8x256xf32>
    %91 = arith.divf %89, %90 : vector<8x256xf32>
    %92 = math.tanh %86 : vector<8x256xf32>
    %93 = vector.extract_strided_slice %91 {offsets = [0, 0], sizes = [8, 64], strides = [1, 1]} : vector<8x256xf32> to vector<8x64xf32>
    %94 = vector.extract_strided_slice %91 {offsets = [0, 64], sizes = [8, 64], strides = [1, 1]} : vector<8x256xf32> to vector<8x64xf32>
    %95 = vector.extract_strided_slice %92 {offsets = [0, 128], sizes = [8, 64], strides = [1, 1]} : vector<8x256xf32> to vector<8x64xf32>
    %96 = vector.extract_strided_slice %91 {offsets = [0, 192], sizes = [8, 64], strides = [1, 1]} : vector<8x256xf32> to vector<8x64xf32>
    %97 = arith.mulf %94, %76 : vector<8x64xf32>
    %98 = arith.mulf %93, %95 : vector<8x64xf32>
    %99 = arith.addf %97, %98 : vector<8x64xf32>
    %100 = math.tanh %99 : vector<8x64xf32>
    %101 = arith.mulf %96, %100 : vector<8x64xf32>
    %102 = arith.index_cast %82 : i32 to index
    %c0_31 = arith.constant 0 : index
    %103 = vector.load %arg9[%102, %c0_31] : memref<64x64xf32, #tpu.memory_space<vmem>>, vector<8x64xf32>
    tpu.vector_store %arg9[%102, %c0_31], %101 {strides = array<i32>} : memref<64x64xf32, #tpu.memory_space<vmem>>, vector<8x64xf32>,
    %c4_i32 = arith.constant 4 : i32
    %c8_i32_32 = arith.constant 8 : i32
    %104 = arith.muli %c4_i32, %c8_i32_32 : i32
    %105 = tpu.assume_multiple %104, 8 : i32
    %106 = arith.index_cast %105 : i32 to index
    %c0_33 = arith.constant 0 : index
    %107 = vector.load %arg10[%106, %c0_33] : memref<64x256xf32, #tpu.memory_space<vmem>>, vector<8x256xf32>
    %cst_34 = arith.constant dense<0.000000e+00> : vector<8x256xf32>
    %108 = tpu.matmul %101, %9, %cst_34 {dimension_numbers = #tpu.dot_dimension_numbers<[1], [0], [0], [1], [0, 0, 1, 1], [], []>} : vector<8x64xf32>, vector<64x256xf32>, vector<8x256xf32> -> vector<8x256xf32>
    %109 = arith.addf %107, %108 : vector<8x256xf32>
    %110 = arith.negf %109 : vector<8x256xf32>
    %111 = math.exp %110 : vector<8x256xf32>
    %cst_35 = arith.constant 1.000000e+00 : f32
    %112 = vector.broadcast %cst_35 : f32 to vector<8x256xf32>
    %113 = arith.addf %112, %111 : vector<8x256xf32>
    %114 = arith.divf %112, %113 : vector<8x256xf32>
    %115 = math.tanh %109 : vector<8x256xf32>
    %116 = vector.extract_strided_slice %114 {offsets = [0, 0], sizes = [8, 64], strides = [1, 1]} : vector<8x256xf32> to vector<8x64xf32>
    %117 = vector.extract_strided_slice %114 {offsets = [0, 64], sizes = [8, 64], strides = [1, 1]} : vector<8x256xf32> to vector<8x64xf32>
    %118 = vector.extract_strided_slice %115 {offsets = [0, 128], sizes = [8, 64], strides = [1, 1]} : vector<8x256xf32> to vector<8x64xf32>
    %119 = vector.extract_strided_slice %114 {offsets = [0, 192], sizes = [8, 64], strides = [1, 1]} : vector<8x256xf32> to vector<8x64xf32>
    %120 = arith.mulf %117, %99 : vector<8x64xf32>
    %121 = arith.mulf %116, %118 : vector<8x64xf32>
    %122 = arith.addf %120, %121 : vector<8x64xf32>
    %123 = math.tanh %122 : vector<8x64xf32>
    %124 = arith.mulf %119, %123 : vector<8x64xf32>
    %125 = arith.index_cast %105 : i32 to index
    %c0_36 = arith.constant 0 : index
    %126 = vector.load %arg9[%125, %c0_36] : memref<64x64xf32, #tpu.memory_space<vmem>>, vector<8x64xf32>
    tpu.vector_store %arg9[%125, %c0_36], %124 {strides = array<i32>} : memref<64x64xf32, #tpu.memory_space<vmem>>, vector<8x64xf32>,
    %c5_i32 = arith.constant 5 : i32
    %c8_i32_37 = arith.constant 8 : i32
    %127 = arith.muli %c5_i32, %c8_i32_37 : i32
    %128 = tpu.assume_multiple %127, 8 : i32
    %129 = arith.index_cast %128 : i32 to index
    %c0_38 = arith.constant 0 : index
    %130 = vector.load %arg10[%129, %c0_38] : memref<64x256xf32, #tpu.memory_space<vmem>>, vector<8x256xf32>
    %cst_39 = arith.constant dense<0.000000e+00> : vector<8x256xf32>
    %131 = tpu.matmul %124, %9, %cst_39 {dimension_numbers = #tpu.dot_dimension_numbers<[1], [0], [0], [1], [0, 0, 1, 1], [], []>} : vector<8x64xf32>, vector<64x256xf32>, vector<8x256xf32> -> vector<8x256xf32>
    %132 = arith.addf %130, %131 : vector<8x256xf32>
    %133 = arith.negf %132 : vector<8x256xf32>
    %134 = math.exp %133 : vector<8x256xf32>
    %cst_40 = arith.constant 1.000000e+00 : f32
    %135 = vector.broadcast %cst_40 : f32 to vector<8x256xf32>
    %136 = arith.addf %135, %134 : vector<8x256xf32>
    %137 = arith.divf %135, %136 : vector<8x256xf32>
    %138 = math.tanh %132 : vector<8x256xf32>
    %139 = vector.extract_strided_slice %137 {offsets = [0, 0], sizes = [8, 64], strides = [1, 1]} : vector<8x256xf32> to vector<8x64xf32>
    %140 = vector.extract_strided_slice %137 {offsets = [0, 64], sizes = [8, 64], strides = [1, 1]} : vector<8x256xf32> to vector<8x64xf32>
    %141 = vector.extract_strided_slice %138 {offsets = [0, 128], sizes = [8, 64], strides = [1, 1]} : vector<8x256xf32> to vector<8x64xf32>
    %142 = vector.extract_strided_slice %137 {offsets = [0, 192], sizes = [8, 64], strides = [1, 1]} : vector<8x256xf32> to vector<8x64xf32>
    %143 = arith.mulf %140, %122 : vector<8x64xf32>
    %144 = arith.mulf %139, %141 : vector<8x64xf32>
    %145 = arith.addf %143, %144 : vector<8x64xf32>
    %146 = math.tanh %145 : vector<8x64xf32>
    %147 = arith.mulf %142, %146 : vector<8x64xf32>
    %148 = arith.index_cast %128 : i32 to index
    %c0_41 = arith.constant 0 : index
    %149 = vector.load %arg9[%148, %c0_41] : memref<64x64xf32, #tpu.memory_space<vmem>>, vector<8x64xf32>
    tpu.vector_store %arg9[%148, %c0_41], %147 {strides = array<i32>} : memref<64x64xf32, #tpu.memory_space<vmem>>, vector<8x64xf32>,
    %c6_i32 = arith.constant 6 : i32
    %c8_i32_42 = arith.constant 8 : i32
    %150 = arith.muli %c6_i32, %c8_i32_42 : i32
    %151 = tpu.assume_multiple %150, 8 : i32
    %152 = arith.index_cast %151 : i32 to index
    %c0_43 = arith.constant 0 : index
    %153 = vector.load %arg10[%152, %c0_43] : memref<64x256xf32, #tpu.memory_space<vmem>>, vector<8x256xf32>
    %cst_44 = arith.constant dense<0.000000e+00> : vector<8x256xf32>
    %154 = tpu.matmul %147, %9, %cst_44 {dimension_numbers = #tpu.dot_dimension_numbers<[1], [0], [0], [1], [0, 0, 1, 1], [], []>} : vector<8x64xf32>, vector<64x256xf32>, vector<8x256xf32> -> vector<8x256xf32>
    %155 = arith.addf %153, %154 : vector<8x256xf32>
    %156 = arith.negf %155 : vector<8x256xf32>
    %157 = math.exp %156 : vector<8x256xf32>
    %cst_45 = arith.constant 1.000000e+00 : f32
    %158 = vector.broadcast %cst_45 : f32 to vector<8x256xf32>
    %159 = arith.addf %158, %157 : vector<8x256xf32>
    %160 = arith.divf %158, %159 : vector<8x256xf32>
    %161 = math.tanh %155 : vector<8x256xf32>
    %162 = vector.extract_strided_slice %160 {offsets = [0, 0], sizes = [8, 64], strides = [1, 1]} : vector<8x256xf32> to vector<8x64xf32>
    %163 = vector.extract_strided_slice %160 {offsets = [0, 64], sizes = [8, 64], strides = [1, 1]} : vector<8x256xf32> to vector<8x64xf32>
    %164 = vector.extract_strided_slice %161 {offsets = [0, 128], sizes = [8, 64], strides = [1, 1]} : vector<8x256xf32> to vector<8x64xf32>
    %165 = vector.extract_strided_slice %160 {offsets = [0, 192], sizes = [8, 64], strides = [1, 1]} : vector<8x256xf32> to vector<8x64xf32>
    %166 = arith.mulf %163, %145 : vector<8x64xf32>
    %167 = arith.mulf %162, %164 : vector<8x64xf32>
    %168 = arith.addf %166, %167 : vector<8x64xf32>
    %169 = math.tanh %168 : vector<8x64xf32>
    %170 = arith.mulf %165, %169 : vector<8x64xf32>
    %171 = arith.index_cast %151 : i32 to index
    %c0_46 = arith.constant 0 : index
    %172 = vector.load %arg9[%171, %c0_46] : memref<64x64xf32, #tpu.memory_space<vmem>>, vector<8x64xf32>
    tpu.vector_store %arg9[%171, %c0_46], %170 {strides = array<i32>} : memref<64x64xf32, #tpu.memory_space<vmem>>, vector<8x64xf32>,
    %c7_i32 = arith.constant 7 : i32
    %c8_i32_47 = arith.constant 8 : i32
    %173 = arith.muli %c7_i32, %c8_i32_47 : i32
    %174 = tpu.assume_multiple %173, 8 : i32
    %175 = arith.index_cast %174 : i32 to index
    %c0_48 = arith.constant 0 : index
    %176 = vector.load %arg10[%175, %c0_48] : memref<64x256xf32, #tpu.memory_space<vmem>>, vector<8x256xf32>
    %cst_49 = arith.constant dense<0.000000e+00> : vector<8x256xf32>
    %177 = tpu.matmul %170, %9, %cst_49 {dimension_numbers = #tpu.dot_dimension_numbers<[1], [0], [0], [1], [0, 0, 1, 1], [], []>} : vector<8x64xf32>, vector<64x256xf32>, vector<8x256xf32> -> vector<8x256xf32>
    %178 = arith.addf %176, %177 : vector<8x256xf32>
    %179 = arith.negf %178 : vector<8x256xf32>
    %180 = math.exp %179 : vector<8x256xf32>
    %cst_50 = arith.constant 1.000000e+00 : f32
    %181 = vector.broadcast %cst_50 : f32 to vector<8x256xf32>
    %182 = arith.addf %181, %180 : vector<8x256xf32>
    %183 = arith.divf %181, %182 : vector<8x256xf32>
    %184 = math.tanh %178 : vector<8x256xf32>
    %185 = vector.extract_strided_slice %183 {offsets = [0, 0], sizes = [8, 64], strides = [1, 1]} : vector<8x256xf32> to vector<8x64xf32>
    %186 = vector.extract_strided_slice %183 {offsets = [0, 64], sizes = [8, 64], strides = [1, 1]} : vector<8x256xf32> to vector<8x64xf32>
    %187 = vector.extract_strided_slice %184 {offsets = [0, 128], sizes = [8, 64], strides = [1, 1]} : vector<8x256xf32> to vector<8x64xf32>
    %188 = vector.extract_strided_slice %183 {offsets = [0, 192], sizes = [8, 64], strides = [1, 1]} : vector<8x256xf32> to vector<8x64xf32>
    %189 = arith.mulf %186, %168 : vector<8x64xf32>
    %190 = arith.mulf %185, %187 : vector<8x64xf32>
    %191 = arith.addf %189, %190 : vector<8x64xf32>
    %192 = math.tanh %191 : vector<8x64xf32>
    %193 = arith.mulf %188, %192 : vector<8x64xf32>
    %194 = arith.index_cast %174 : i32 to index
    %c0_51 = arith.constant 0 : index
    %195 = vector.load %arg9[%194, %c0_51] : memref<64x64xf32, #tpu.memory_space<vmem>>, vector<8x64xf32>
    tpu.vector_store %arg9[%194, %c0_51], %193 {strides = array<i32>} : memref<64x64xf32, #tpu.memory_space<vmem>>, vector<8x64xf32>,
    %c8_i32_52 = arith.constant 8 : i32
    %c0_53 = arith.constant 0 : index
    %c0_54 = arith.constant 0 : index
    %196 = vector.load %arg9[%c0_53, %c0_54] : memref<64x64xf32, #tpu.memory_space<vmem>>, vector<64x64xf32>
    %c0_55 = arith.constant 0 : index
    %c0_56 = arith.constant 0 : index
    %c0_57 = arith.constant 0 : index
    %197 = vector.load %arg3[%c0_55, %c0_56, %c0_57] : memref<1x64x256xf32, #tpu.memory_space<vmem>>, vector<1x64x256xf32>
    %198 = vector.shape_cast %197 : vector<1x64x256xf32> to vector<64x256xf32>
    %cst_58 = arith.constant dense<0.000000e+00> : vector<64x256xf32>
    %199 = tpu.matmul %196, %198, %cst_58 {dimension_numbers = #tpu.dot_dimension_numbers<[1], [0], [0], [1], [0, 0, 1, 1], [], []>} : vector<64x64xf32>, vector<64x256xf32>, vector<64x256xf32> -> vector<64x256xf32>
    %c1 = arith.constant 1 : index
    %c0_59 = arith.constant 0 : index
    %c0_60 = arith.constant 0 : index
    %200 = vector.load %arg5[%c1, %c0_59, %c0_60] : memref<2x1x256xf32, #tpu.memory_space<vmem>>, vector<1x1x256xf32>
    %201 = vector.shape_cast %200 : vector<1x1x256xf32> to vector<1x256xf32>
    %202 = vector.broadcast %201 : vector<1x256xf32> to vector<64x256xf32>
    %203 = arith.addf %199, %202 : vector<64x256xf32>
    %c0_61 = arith.constant 0 : index
    %c0_62 = arith.constant 0 : index
    %204 = vector.load %arg10[%c0_61, %c0_62] : memref<64x256xf32, #tpu.memory_space<vmem>>, vector<64x256xf32>
    tpu.vector_store %arg10[%c0_61, %c0_62], %203 {strides = array<i32>} : memref<64x256xf32, #tpu.memory_space<vmem>>, vector<64x256xf32>,
    %c1_63 = arith.constant 1 : index
    %c0_64 = arith.constant 0 : index
    %c0_65 = arith.constant 0 : index
    %205 = vector.load %arg4[%c1_63, %c0_64, %c0_65] : memref<2x64x256xf32, #tpu.memory_space<vmem>>, vector<1x64x256xf32>
    %206 = vector.shape_cast %205 : vector<1x64x256xf32> to vector<64x256xf32>
    %cst_66 = arith.constant 0.000000e+00 : f32
    %207 = vector.broadcast %cst_66 : f32 to vector<8x64xf32>
    %cst_67 = arith.constant 0.000000e+00 : f32
    %208 = vector.broadcast %cst_67 : f32 to vector<8x64xf32>
    %c0_i32_68 = arith.constant 0 : i32
    %c8_i32_69 = arith.constant 8 : i32
    %209 = arith.muli %c0_i32_68, %c8_i32_69 : i32
    %210 = tpu.assume_multiple %209, 8 : i32
    %211 = arith.index_cast %210 : i32 to index
    %c0_70 = arith.constant 0 : index
    %212 = vector.load %arg10[%211, %c0_70] : memref<64x256xf32, #tpu.memory_space<vmem>>, vector<8x256xf32>
    %cst_71 = arith.constant dense<0.000000e+00> : vector<8x256xf32>
    %213 = tpu.matmul %207, %206, %cst_71 {dimension_numbers = #tpu.dot_dimension_numbers<[1], [0], [0], [1], [0, 0, 1, 1], [], []>} : vector<8x64xf32>, vector<64x256xf32>, vector<8x256xf32> -> vector<8x256xf32>
    %214 = arith.addf %212, %213 : vector<8x256xf32>
    %215 = arith.negf %214 : vector<8x256xf32>
    %216 = math.exp %215 : vector<8x256xf32>
    %cst_72 = arith.constant 1.000000e+00 : f32
    %217 = vector.broadcast %cst_72 : f32 to vector<8x256xf32>
    %218 = arith.addf %217, %216 : vector<8x256xf32>
    %219 = arith.divf %217, %218 : vector<8x256xf32>
    %220 = math.tanh %214 : vector<8x256xf32>
    %221 = vector.extract_strided_slice %219 {offsets = [0, 0], sizes = [8, 64], strides = [1, 1]} : vector<8x256xf32> to vector<8x64xf32>
    %222 = vector.extract_strided_slice %219 {offsets = [0, 64], sizes = [8, 64], strides = [1, 1]} : vector<8x256xf32> to vector<8x64xf32>
    %223 = vector.extract_strided_slice %220 {offsets = [0, 128], sizes = [8, 64], strides = [1, 1]} : vector<8x256xf32> to vector<8x64xf32>
    %224 = vector.extract_strided_slice %219 {offsets = [0, 192], sizes = [8, 64], strides = [1, 1]} : vector<8x256xf32> to vector<8x64xf32>
    %225 = arith.mulf %222, %208 : vector<8x64xf32>
    %226 = arith.mulf %221, %223 : vector<8x64xf32>
    %227 = arith.addf %225, %226 : vector<8x64xf32>
    %228 = math.tanh %227 : vector<8x64xf32>
    %229 = arith.mulf %224, %228 : vector<8x64xf32>
    %c1_i32_73 = arith.constant 1 : i32
    %c8_i32_74 = arith.constant 8 : i32
    %230 = arith.muli %c1_i32_73, %c8_i32_74 : i32
    %231 = tpu.assume_multiple %230, 8 : i32
    %232 = arith.index_cast %231 : i32 to index
    %c0_75 = arith.constant 0 : index
    %233 = vector.load %arg10[%232, %c0_75] : memref<64x256xf32, #tpu.memory_space<vmem>>, vector<8x256xf32>
    %cst_76 = arith.constant dense<0.000000e+00> : vector<8x256xf32>
    %234 = tpu.matmul %229, %206, %cst_76 {dimension_numbers = #tpu.dot_dimension_numbers<[1], [0], [0], [1], [0, 0, 1, 1], [], []>} : vector<8x64xf32>, vector<64x256xf32>, vector<8x256xf32> -> vector<8x256xf32>
    %235 = arith.addf %233, %234 : vector<8x256xf32>
    %236 = arith.negf %235 : vector<8x256xf32>
    %237 = math.exp %236 : vector<8x256xf32>
    %cst_77 = arith.constant 1.000000e+00 : f32
    %238 = vector.broadcast %cst_77 : f32 to vector<8x256xf32>
    %239 = arith.addf %238, %237 : vector<8x256xf32>
    %240 = arith.divf %238, %239 : vector<8x256xf32>
    %241 = math.tanh %235 : vector<8x256xf32>
    %242 = vector.extract_strided_slice %240 {offsets = [0, 0], sizes = [8, 64], strides = [1, 1]} : vector<8x256xf32> to vector<8x64xf32>
    %243 = vector.extract_strided_slice %240 {offsets = [0, 64], sizes = [8, 64], strides = [1, 1]} : vector<8x256xf32> to vector<8x64xf32>
    %244 = vector.extract_strided_slice %241 {offsets = [0, 128], sizes = [8, 64], strides = [1, 1]} : vector<8x256xf32> to vector<8x64xf32>
    %245 = vector.extract_strided_slice %240 {offsets = [0, 192], sizes = [8, 64], strides = [1, 1]} : vector<8x256xf32> to vector<8x64xf32>
    %246 = arith.mulf %243, %227 : vector<8x64xf32>
    %247 = arith.mulf %242, %244 : vector<8x64xf32>
    %248 = arith.addf %246, %247 : vector<8x64xf32>
    %249 = math.tanh %248 : vector<8x64xf32>
    %250 = arith.mulf %245, %249 : vector<8x64xf32>
    %c2_i32_78 = arith.constant 2 : i32
    %c8_i32_79 = arith.constant 8 : i32
    %251 = arith.muli %c2_i32_78, %c8_i32_79 : i32
    %252 = tpu.assume_multiple %251, 8 : i32
    %253 = arith.index_cast %252 : i32 to index
    %c0_80 = arith.constant 0 : index
    %254 = vector.load %arg10[%253, %c0_80] : memref<64x256xf32, #tpu.memory_space<vmem>>, vector<8x256xf32>
    %cst_81 = arith.constant dense<0.000000e+00> : vector<8x256xf32>
    %255 = tpu.matmul %250, %206, %cst_81 {dimension_numbers = #tpu.dot_dimension_numbers<[1], [0], [0], [1], [0, 0, 1, 1], [], []>} : vector<8x64xf32>, vector<64x256xf32>, vector<8x256xf32> -> vector<8x256xf32>
    %256 = arith.addf %254, %255 : vector<8x256xf32>
    %257 = arith.negf %256 : vector<8x256xf32>
    %258 = math.exp %257 : vector<8x256xf32>
    %cst_82 = arith.constant 1.000000e+00 : f32
    %259 = vector.broadcast %cst_82 : f32 to vector<8x256xf32>
    %260 = arith.addf %259, %258 : vector<8x256xf32>
    %261 = arith.divf %259, %260 : vector<8x256xf32>
    %262 = math.tanh %256 : vector<8x256xf32>
    %263 = vector.extract_strided_slice %261 {offsets = [0, 0], sizes = [8, 64], strides = [1, 1]} : vector<8x256xf32> to vector<8x64xf32>
    %264 = vector.extract_strided_slice %261 {offsets = [0, 64], sizes = [8, 64], strides = [1, 1]} : vector<8x256xf32> to vector<8x64xf32>
    %265 = vector.extract_strided_slice %262 {offsets = [0, 128], sizes = [8, 64], strides = [1, 1]} : vector<8x256xf32> to vector<8x64xf32>
    %266 = vector.extract_strided_slice %261 {offsets = [0, 192], sizes = [8, 64], strides = [1, 1]} : vector<8x256xf32> to vector<8x64xf32>
    %267 = arith.mulf %264, %248 : vector<8x64xf32>
    %268 = arith.mulf %263, %265 : vector<8x64xf32>
    %269 = arith.addf %267, %268 : vector<8x64xf32>
    %270 = math.tanh %269 : vector<8x64xf32>
    %271 = arith.mulf %266, %270 : vector<8x64xf32>
    %c3_i32_83 = arith.constant 3 : i32
    %c8_i32_84 = arith.constant 8 : i32
    %272 = arith.muli %c3_i32_83, %c8_i32_84 : i32
    %273 = tpu.assume_multiple %272, 8 : i32
    %274 = arith.index_cast %273 : i32 to index
    %c0_85 = arith.constant 0 : index
    %275 = vector.load %arg10[%274, %c0_85] : memref<64x256xf32, #tpu.memory_space<vmem>>, vector<8x256xf32>
    %cst_86 = arith.constant dense<0.000000e+00> : vector<8x256xf32>
    %276 = tpu.matmul %271, %206, %cst_86 {dimension_numbers = #tpu.dot_dimension_numbers<[1], [0], [0], [1], [0, 0, 1, 1], [], []>} : vector<8x64xf32>, vector<64x256xf32>, vector<8x256xf32> -> vector<8x256xf32>
    %277 = arith.addf %275, %276 : vector<8x256xf32>
    %278 = arith.negf %277 : vector<8x256xf32>
    %279 = math.exp %278 : vector<8x256xf32>
    %cst_87 = arith.constant 1.000000e+00 : f32
    %280 = vector.broadcast %cst_87 : f32 to vector<8x256xf32>
    %281 = arith.addf %280, %279 : vector<8x256xf32>
    %282 = arith.divf %280, %281 : vector<8x256xf32>
    %283 = math.tanh %277 : vector<8x256xf32>
    %284 = vector.extract_strided_slice %282 {offsets = [0, 0], sizes = [8, 64], strides = [1, 1]} : vector<8x256xf32> to vector<8x64xf32>
    %285 = vector.extract_strided_slice %282 {offsets = [0, 64], sizes = [8, 64], strides = [1, 1]} : vector<8x256xf32> to vector<8x64xf32>
    %286 = vector.extract_strided_slice %283 {offsets = [0, 128], sizes = [8, 64], strides = [1, 1]} : vector<8x256xf32> to vector<8x64xf32>
    %287 = vector.extract_strided_slice %282 {offsets = [0, 192], sizes = [8, 64], strides = [1, 1]} : vector<8x256xf32> to vector<8x64xf32>
    %288 = arith.mulf %285, %269 : vector<8x64xf32>
    %289 = arith.mulf %284, %286 : vector<8x64xf32>
    %290 = arith.addf %288, %289 : vector<8x64xf32>
    %291 = math.tanh %290 : vector<8x64xf32>
    %292 = arith.mulf %287, %291 : vector<8x64xf32>
    %c4_i32_88 = arith.constant 4 : i32
    %c8_i32_89 = arith.constant 8 : i32
    %293 = arith.muli %c4_i32_88, %c8_i32_89 : i32
    %294 = tpu.assume_multiple %293, 8 : i32
    %295 = arith.index_cast %294 : i32 to index
    %c0_90 = arith.constant 0 : index
    %296 = vector.load %arg10[%295, %c0_90] : memref<64x256xf32, #tpu.memory_space<vmem>>, vector<8x256xf32>
    %cst_91 = arith.constant dense<0.000000e+00> : vector<8x256xf32>
    %297 = tpu.matmul %292, %206, %cst_91 {dimension_numbers = #tpu.dot_dimension_numbers<[1], [0], [0], [1], [0, 0, 1, 1], [], []>} : vector<8x64xf32>, vector<64x256xf32>, vector<8x256xf32> -> vector<8x256xf32>
    %298 = arith.addf %296, %297 : vector<8x256xf32>
    %299 = arith.negf %298 : vector<8x256xf32>
    %300 = math.exp %299 : vector<8x256xf32>
    %cst_92 = arith.constant 1.000000e+00 : f32
    %301 = vector.broadcast %cst_92 : f32 to vector<8x256xf32>
    %302 = arith.addf %301, %300 : vector<8x256xf32>
    %303 = arith.divf %301, %302 : vector<8x256xf32>
    %304 = math.tanh %298 : vector<8x256xf32>
    %305 = vector.extract_strided_slice %303 {offsets = [0, 0], sizes = [8, 64], strides = [1, 1]} : vector<8x256xf32> to vector<8x64xf32>
    %306 = vector.extract_strided_slice %303 {offsets = [0, 64], sizes = [8, 64], strides = [1, 1]} : vector<8x256xf32> to vector<8x64xf32>
    %307 = vector.extract_strided_slice %304 {offsets = [0, 128], sizes = [8, 64], strides = [1, 1]} : vector<8x256xf32> to vector<8x64xf32>
    %308 = vector.extract_strided_slice %303 {offsets = [0, 192], sizes = [8, 64], strides = [1, 1]} : vector<8x256xf32> to vector<8x64xf32>
    %309 = arith.mulf %306, %290 : vector<8x64xf32>
    %310 = arith.mulf %305, %307 : vector<8x64xf32>
    %311 = arith.addf %309, %310 : vector<8x64xf32>
    %312 = math.tanh %311 : vector<8x64xf32>
    %313 = arith.mulf %308, %312 : vector<8x64xf32>
    %c5_i32_93 = arith.constant 5 : i32
    %c8_i32_94 = arith.constant 8 : i32
    %314 = arith.muli %c5_i32_93, %c8_i32_94 : i32
    %315 = tpu.assume_multiple %314, 8 : i32
    %316 = arith.index_cast %315 : i32 to index
    %c0_95 = arith.constant 0 : index
    %317 = vector.load %arg10[%316, %c0_95] : memref<64x256xf32, #tpu.memory_space<vmem>>, vector<8x256xf32>
    %cst_96 = arith.constant dense<0.000000e+00> : vector<8x256xf32>
    %318 = tpu.matmul %313, %206, %cst_96 {dimension_numbers = #tpu.dot_dimension_numbers<[1], [0], [0], [1], [0, 0, 1, 1], [], []>} : vector<8x64xf32>, vector<64x256xf32>, vector<8x256xf32> -> vector<8x256xf32>
    %319 = arith.addf %317, %318 : vector<8x256xf32>
    %320 = arith.negf %319 : vector<8x256xf32>
    %321 = math.exp %320 : vector<8x256xf32>
    %cst_97 = arith.constant 1.000000e+00 : f32
    %322 = vector.broadcast %cst_97 : f32 to vector<8x256xf32>
    %323 = arith.addf %322, %321 : vector<8x256xf32>
    %324 = arith.divf %322, %323 : vector<8x256xf32>
    %325 = math.tanh %319 : vector<8x256xf32>
    %326 = vector.extract_strided_slice %324 {offsets = [0, 0], sizes = [8, 64], strides = [1, 1]} : vector<8x256xf32> to vector<8x64xf32>
    %327 = vector.extract_strided_slice %324 {offsets = [0, 64], sizes = [8, 64], strides = [1, 1]} : vector<8x256xf32> to vector<8x64xf32>
    %328 = vector.extract_strided_slice %325 {offsets = [0, 128], sizes = [8, 64], strides = [1, 1]} : vector<8x256xf32> to vector<8x64xf32>
    %329 = vector.extract_strided_slice %324 {offsets = [0, 192], sizes = [8, 64], strides = [1, 1]} : vector<8x256xf32> to vector<8x64xf32>
    %330 = arith.mulf %327, %311 : vector<8x64xf32>
    %331 = arith.mulf %326, %328 : vector<8x64xf32>
    %332 = arith.addf %330, %331 : vector<8x64xf32>
    %333 = math.tanh %332 : vector<8x64xf32>
    %334 = arith.mulf %329, %333 : vector<8x64xf32>
    %c6_i32_98 = arith.constant 6 : i32
    %c8_i32_99 = arith.constant 8 : i32
    %335 = arith.muli %c6_i32_98, %c8_i32_99 : i32
    %336 = tpu.assume_multiple %335, 8 : i32
    %337 = arith.index_cast %336 : i32 to index
    %c0_100 = arith.constant 0 : index
    %338 = vector.load %arg10[%337, %c0_100] : memref<64x256xf32, #tpu.memory_space<vmem>>, vector<8x256xf32>
    %cst_101 = arith.constant dense<0.000000e+00> : vector<8x256xf32>
    %339 = tpu.matmul %334, %206, %cst_101 {dimension_numbers = #tpu.dot_dimension_numbers<[1], [0], [0], [1], [0, 0, 1, 1], [], []>} : vector<8x64xf32>, vector<64x256xf32>, vector<8x256xf32> -> vector<8x256xf32>
    %340 = arith.addf %338, %339 : vector<8x256xf32>
    %341 = arith.negf %340 : vector<8x256xf32>
    %342 = math.exp %341 : vector<8x256xf32>
    %cst_102 = arith.constant 1.000000e+00 : f32
    %343 = vector.broadcast %cst_102 : f32 to vector<8x256xf32>
    %344 = arith.addf %343, %342 : vector<8x256xf32>
    %345 = arith.divf %343, %344 : vector<8x256xf32>
    %346 = math.tanh %340 : vector<8x256xf32>
    %347 = vector.extract_strided_slice %345 {offsets = [0, 0], sizes = [8, 64], strides = [1, 1]} : vector<8x256xf32> to vector<8x64xf32>
    %348 = vector.extract_strided_slice %345 {offsets = [0, 64], sizes = [8, 64], strides = [1, 1]} : vector<8x256xf32> to vector<8x64xf32>
    %349 = vector.extract_strided_slice %346 {offsets = [0, 128], sizes = [8, 64], strides = [1, 1]} : vector<8x256xf32> to vector<8x64xf32>
    %350 = vector.extract_strided_slice %345 {offsets = [0, 192], sizes = [8, 64], strides = [1, 1]} : vector<8x256xf32> to vector<8x64xf32>
    %351 = arith.mulf %348, %332 : vector<8x64xf32>
    %352 = arith.mulf %347, %349 : vector<8x64xf32>
    %353 = arith.addf %351, %352 : vector<8x64xf32>
    %354 = math.tanh %353 : vector<8x64xf32>
    %355 = arith.mulf %350, %354 : vector<8x64xf32>
    %c7_i32_103 = arith.constant 7 : i32
    %c8_i32_104 = arith.constant 8 : i32
    %356 = arith.muli %c7_i32_103, %c8_i32_104 : i32
    %357 = tpu.assume_multiple %356, 8 : i32
    %358 = arith.index_cast %357 : i32 to index
    %c0_105 = arith.constant 0 : index
    %359 = vector.load %arg10[%358, %c0_105] : memref<64x256xf32, #tpu.memory_space<vmem>>, vector<8x256xf32>
    %cst_106 = arith.constant dense<0.000000e+00> : vector<8x256xf32>
    %360 = tpu.matmul %355, %206, %cst_106 {dimension_numbers = #tpu.dot_dimension_numbers<[1], [0], [0], [1], [0, 0, 1, 1], [], []>} : vector<8x64xf32>, vector<64x256xf32>, vector<8x256xf32> -> vector<8x256xf32>
    %361 = arith.addf %359, %360 : vector<8x256xf32>
    %362 = arith.negf %361 : vector<8x256xf32>
    %363 = math.exp %362 : vector<8x256xf32>
    %cst_107 = arith.constant 1.000000e+00 : f32
    %364 = vector.broadcast %cst_107 : f32 to vector<8x256xf32>
    %365 = arith.addf %364, %363 : vector<8x256xf32>
    %366 = arith.divf %364, %365 : vector<8x256xf32>
    %367 = math.tanh %361 : vector<8x256xf32>
    %368 = vector.extract_strided_slice %366 {offsets = [0, 0], sizes = [8, 64], strides = [1, 1]} : vector<8x256xf32> to vector<8x64xf32>
    %369 = vector.extract_strided_slice %366 {offsets = [0, 64], sizes = [8, 64], strides = [1, 1]} : vector<8x256xf32> to vector<8x64xf32>
    %370 = vector.extract_strided_slice %367 {offsets = [0, 128], sizes = [8, 64], strides = [1, 1]} : vector<8x256xf32> to vector<8x64xf32>
    %371 = vector.extract_strided_slice %366 {offsets = [0, 192], sizes = [8, 64], strides = [1, 1]} : vector<8x256xf32> to vector<8x64xf32>
    %372 = arith.mulf %369, %353 : vector<8x64xf32>
    %373 = arith.mulf %368, %370 : vector<8x64xf32>
    %374 = arith.addf %372, %373 : vector<8x64xf32>
    %375 = math.tanh %374 : vector<8x64xf32>
    %376 = arith.mulf %371, %375 : vector<8x64xf32>
    %c8_i32_108 = arith.constant 8 : i32
    %c0_109 = arith.constant 0 : index
    %c0_110 = arith.constant 0 : index
    %377 = vector.load %arg6[%c0_109, %c0_110] : memref<64x128xf32, #tpu.memory_space<vmem>>, vector<64x128xf32>
    %cst_111 = arith.constant dense<0.000000e+00> : vector<8x128xf32>
    %378 = tpu.matmul %376, %377, %cst_111 {dimension_numbers = #tpu.dot_dimension_numbers<[1], [0], [0], [1], [0, 0, 1, 1], [], []>} : vector<8x64xf32>, vector<64x128xf32>, vector<8x128xf32> -> vector<8x128xf32>
    %c0_112 = arith.constant 0 : index
    %c0_113 = arith.constant 0 : index
    %379 = vector.load %arg7[%c0_112, %c0_113] : memref<1x128xf32, #tpu.memory_space<vmem>>, vector<1x128xf32>
    %380 = vector.broadcast %379 : vector<1x128xf32> to vector<8x128xf32>
    %381 = arith.addf %378, %380 : vector<8x128xf32>
    %c0_114 = arith.constant 0 : index
    %c0_115 = arith.constant 0 : index
    %382 = vector.load %arg8[%c0_114, %c0_115] : memref<8x128xf32, #tpu.memory_space<vmem>>, vector<8x128xf32>
    tpu.vector_store %arg8[%c0_114, %c0_115], %381 {strides = array<i32>} : memref<8x128xf32, #tpu.memory_space<vmem>>, vector<8x128xf32>,
    return
  }
  func.func @transform_0(%arg0: i32) -> (i32, i32) {
    %c0_i32 = arith.constant 0 : i32
    %c0_i32_0 = arith.constant 0 : i32
    %c0_i32_1 = arith.constant 0 : i32
    return %c0_i32, %c0_i32_0 : i32, i32
  }
  func.func @transform_1(%arg0: i32) -> (i32, i32) {
    %c0_i32 = arith.constant 0 : i32
    %c0_i32_0 = arith.constant 0 : i32
    %c0_i32_1 = arith.constant 0 : i32
    return %c0_i32, %c0_i32_0 : i32, i32
  }
  func.func @transform_2(%arg0: i32) -> (i32, i32, i32) {
    %c0_i32 = arith.constant 0 : i32
    %c0_i32_0 = arith.constant 0 : i32
    %c0_i32_1 = arith.constant 0 : i32
    %c0_i32_2 = arith.constant 0 : i32
    return %c0_i32, %c0_i32_0, %c0_i32_1 : i32, i32, i32
  }
  func.func @transform_3(%arg0: i32) -> (i32, i32, i32) {
    %c0_i32 = arith.constant 0 : i32
    %c0_i32_0 = arith.constant 0 : i32
    %c0_i32_1 = arith.constant 0 : i32
    %c0_i32_2 = arith.constant 0 : i32
    return %c0_i32, %c0_i32_0, %c0_i32_1 : i32, i32, i32
  }
  func.func @transform_4(%arg0: i32) -> (i32, i32, i32) {
    %c0_i32 = arith.constant 0 : i32
    %c0_i32_0 = arith.constant 0 : i32
    %c0_i32_1 = arith.constant 0 : i32
    %c0_i32_2 = arith.constant 0 : i32
    return %c0_i32, %c0_i32_0, %c0_i32_1 : i32, i32, i32
  }
  func.func @transform_5(%arg0: i32) -> (i32, i32) {
    %c0_i32 = arith.constant 0 : i32
    %c0_i32_0 = arith.constant 0 : i32
    %c0_i32_1 = arith.constant 0 : i32
    return %c0_i32, %c0_i32_0 : i32, i32
  }
  func.func @transform_6(%arg0: i32) -> (i32, i32) {
    %c0_i32 = arith.constant 0 : i32
    %c0_i32_0 = arith.constant 0 : i32
    %c0_i32_1 = arith.constant 0 : i32
    return %c0_i32, %c0_i32_0 : i32, i32
  }
  func.func @transform_7(%arg0: i32) -> (i32, i32) {
    %c0_i32 = arith.constant 0 : i32
    %c0_i32_0 = arith.constant 0 : i32
    %c0_i32_1 = arith.constant 0 : i32
    return %c0_i32, %c0_i32_0 : i32, i32
  }
}

</mosaic_0001>

<bundles_post_ra>
// kernel: _forward_impl.1
= control target key start
LH: loop header
LB: loop body
LE: loop exit
PB: predicated region body
PF: predicated region fallthrough
CT: control target
= control target key end

     0   :  { %vm75_vm0 = vcmask 1043456   ;;  %v2901_v3 = vmov 0.0   ;;  %vm50_vm1 = vcmask 31744   ;;  %s3482_s0 = inlined_call_operand.vmem [shape: f32[64,4], index: 0, kind: input, shape index: {}]   ;;  %s3483_s1 = inlined_call_operand.vmem [shape: f32[4,256], index: 1, kind: input, shape index: {}]   ;;  %s3484_s2 = inlined_call_operand.vmem [shape: f32[1,64,256], index: 2, kind: input, shape index: {}]   ;;  %s3485_s3 = inlined_call_operand.vmem [shape: f32[2,64,256], index: 3, kind: input, shape index: {}]   ;;  %s3486_s4 = inlined_call_operand.vmem [shape: f32[2,1,256], index: 4, kind: input, shape index: {}]   ;;  %s3487_s5 = inlined_call_operand.vmem [shape: f32[64,128], index: 5, kind: input, shape index: {}]   ;;  %s3488_s6 = inlined_call_operand.vmem [shape: f32[1,128], index: 6, kind: input, shape index: {}]   ;;  %s3489_s7 = inlined_call_operand.hbm [shape: f32[8,128], index: 7, kind: output, shape index: {}]  }
   0x1   :  { %v35_v0 = vld [vmem:[%s3483_s1] sm:$0xff]  ;;  %v210_v1 = vld [vmem:[%s3485_s3 + $0x8] sm:$0xff]  ;;  %144 = vmatprep.mubr.f32.mxu0 %v2901_v3  ;;  %v212_v4 = vld [vmem:[%s3485_s3 + $0x18] sm:$0xff]  ;;  %1215 = vmatprep.mubr.f32.mxu1 %v2901_v3 }
   0x2   :  { %v49_v2 = vcombine.high %v35_v0, %v35_v0  ;;  %v209_v5 = vld [vmem:[%s3485_s3] sm:$0xff]  ;;  %v211_v6 = vld [vmem:[%s3485_s3 + $0x10] sm:$0xff]  ;;  %v2966_v8 = vpack.c.bf16 %v212_v4, %v210_v1  ;;  %v214_v10 = vld [vmem:[%s3485_s3 + $0x28] sm:$0xff] }
   0x3   :  { %v27_v7 = vld [vmem:[%s3482_s0] sm:$0xff]  ;;  %v2968_v9 = vpack.c.bf16 %v211_v6, %v209_v5  ;;  %v216_v11 = vld [vmem:[%s3485_s3 + $0x38] sm:$0xff]  ;;  %v215_v13 = vld [vmem:[%s3485_s3 + $0x30] sm:$0xff] }
   0x4   :  { %2220 = vmatprep.subr.msk.mxu0 %vm75_vm0, %v49_v2  ;;  %v213_v12 = vld [vmem:[%s3485_s3 + $0x20] sm:$0xff]  ;;  %v2984_v14 = vpack.c.bf16 %v216_v11, %v214_v10  ;;  %v218_v15 = vld [vmem:[%s3485_s3 + $0x48] sm:$0xff]  ;;  %v220_v16 = vld [vmem:[%s3485_s3 + $0x58] sm:$0xff] }
   0x5   :  { %2221 = vmatpush1.msk.msra.mxu0 %vm75_vm0, %v35_v0  ;;  %v28_v17 = vld [vmem:[%s3482_s0 + $0x8] sm:$0xff]  ;;  %v2999_v18 = vpack.c.bf16 %v215_v13, %v213_v12  ;;  %v3002_v19 = vpack.c.bf16 %v220_v16, %v218_v15  ;;  %v217_v20 = vld [vmem:[%s3485_s3 + $0x40] sm:$0xff]  ;;  %v219_v21 = vld [vmem:[%s3485_s3 + $0x50] sm:$0xff] }
   0x6   :  { %2222 = vmatmul.mubr.msk.f32.vlgmr.msra.gmra.mrb[0].mxu0 %vm50_vm1, %v27_v7  ;;  %2332 = vmatprep.subr.bf16.mxu0 %v2966_v8  ;;  %v222_v22 = vld [vmem:[%s3485_s3 + $0x68] sm:$0xff]  ;;  %v224_v23 = vld [vmem:[%s3485_s3 + $0x78] sm:$0xff] }
   0x7   :  { %2334 = vmatpush1.bf16.msra.mxu0 %v2968_v9  ;;  %150 = vmatprep.mubr.f32.mxu0 %v2901_v3 }
   0x8   :  { %2336 = vmatprep.subr.bf16.mxu0 %v2984_v14 }
   0x9   :  { %12 = vsyncpa [#allocation5], 0  ;;  %v29_v24 = vld [vmem:[%s3482_s0 + $0x10] sm:$0xff]  ;;  %v3022_v25 = vpack.c.bf16 %v219_v21, %v217_v20  ;;  %v3025_v26 = vpack.c.bf16 %v224_v23, %v222_v22  ;;  %v221_v27 = vld [vmem:[%s3485_s3 + $0x60] sm:$0xff]  ;;  %v38_v35 = vlaneseq  ;;  %s2902_s27 = smov 64   ;;  %vm230_vm2 = vcmask 523264  }
   0xa   :  { %2223 = vmatmul.mubr.msk.f32.gmra.mrb[2].mxu0 %vm50_vm1, %v28_v17  ;;  %v223_v28 = vld [vmem:[%s3485_s3 + $0x70] sm:$0xff]  ;;  %v30_v29 = vld [vmem:[%s3482_s0 + $0x18] sm:$0xff]  ;;  %v31_v31 = vld [vmem:[%s3482_s0 + $0x20] sm:$0xff]  ;;  %vm2904_vm3 = vmmov 0   ;;  %s2905_s11 = smov [#allocation4]  }
   0xb   :  { %156 = vmatprep.mubr.f32.mxu0 %v2901_v3  ;;  %2338 = vmatpush1.bf16.msra.mxu0 %v2999_v18  ;;  %v3039_v30 = vpack.c.bf16 %v223_v28, %v221_v27  ;;  %v32_v32 = vld [vmem:[%s3482_s0 + $0x28] sm:$0xff]  ;;  %v33_v33 = vld [vmem:[%s3482_s0 + $0x30] sm:$0xff]  ;;  %v34_v34 = vld [vmem:[%s3482_s0 + $0x38] sm:$0xff]  ;;  %v3076_v36 = vshrl.u32 %v38_v35, 7 }
   0xc   :  { %2340 = vmatprep.subr.bf16.mxu0 %v3002_v19  ;;  %v36_v38 = vld [vmem:[%s3486_s4] sm:$0x3]  ;;  %v1099_v52 = vld [vmem:[%s3484_s2 + $0x8] sm:$0xff]  ;;  %v1101_v53 = vld [vmem:[%s3484_s2 + $0x18] sm:$0xff] }
   0xd   :  { %v40_v37 = vsub.s32 0, %v3076_v36  ;;  %v44_v44 = vsub.s32 1, %v3076_v36  ;;  %v1098_v54 = vld [vmem:[%s3484_s2] sm:$0xff]  ;;  %v2459_v55 = vpack.c.bf16 %v1101_v53, %v1099_v52  ;;  %v1100_v56 = vld [vmem:[%s3484_s2 + $0x10] sm:$0xff]  ;;  %v1103_v57 = vld [vmem:[%s3484_s2 + $0x28] sm:$0xff] }
   0xe   :  { %2224 = vmatmul.mubr.msk.f32.gmra.mrb[4].mxu0 %vm50_vm1, %v29_v24  ;;  %v1105_v58 = vld [vmem:[%s3484_s2 + $0x38] sm:$0xff]  ;;  %v2461_v59 = vpack.c.bf16 %v1100_v56, %v1098_v54  ;;  %v1102_v61 = vld [vmem:[%s3484_s2 + $0x20] sm:$0xff]  ;;  %v1104_v62 = vld [vmem:[%s3484_s2 + $0x30] sm:$0xff] }
   0xf   :  { %162 = vmatprep.mubr.f32.mxu0 %v2901_v3  ;;  %2342 = vmatpush1.bf16.msra.mxu0 %v3022_v25  ;;  %v3084_v39 = vrot.slane %v36_v38, %v40_v37  ;;  %v3090_v45 = vrot.slane %v36_v38, %v44_v44  ;;  %v2463_v60 = vpack.c.bf16 %v1105_v58, %v1103_v57  ;;  %v1107_v6 = vld [vmem:[%s3484_s2 + $0x48] sm:$0xff]  ;;  %v1109_v7 = vld [vmem:[%s3484_s2 + $0x58] sm:$0xff]  ;;  %v1106_v12 = vld [vmem:[%s3484_s2 + $0x40] sm:$0xff] }
  0x10   :  { %2344 = vmatprep.subr.bf16.mxu0 %v3025_v26  ;;  %2460 = vmatprep.subr.bf16.mxu1 %v2459_v55  ;;  %v2465_v63 = vpack.c.bf16 %v1104_v62, %v1102_v61  ;;  %v2467_v11 = vpack.c.bf16 %v1109_v7, %v1107_v6  ;;  %v1108_v13 = vld [vmem:[%s3484_s2 + $0x50] sm:$0xff]  ;;  %v1111_v16 = vld [vmem:[%s3484_s2 + $0x68] sm:$0xff]  ;;  %v1113_v17 = vld [vmem:[%s3484_s2 + $0x78] sm:$0xff] }
  0x11   :  { %2462 = vmatpush1.bf16.msra.mxu1 %v2461_v59  ;;  %v2469_v15 = vpack.c.bf16 %v1108_v13, %v1106_v12  ;;  %v1110_v20 = vld [vmem:[%s3484_s2 + $0x60] sm:$0xff]  ;;  %v2471_v21 = vpack.c.bf16 %v1113_v17, %v1111_v16  ;;  %v1112_v22 = vld [vmem:[%s3484_s2 + $0x70] sm:$0xff]  ;;  %s2205_s2 = sshll.u32 %s2905_s11, 4  ;;  %s2206_s2 = int_to_ptr.vmem [resolvable:$true] %s2205_s2 }
  0x12   :  { %2225 = vmatmul.mubr.msk.f32.gmra.mrb[6].mxu0 %vm50_vm1, %v30_v29  ;;  %2464 = vmatprep.subr.bf16.mxu1 %v2463_v60  ;;  %v2473_v23 = vpack.c.bf16 %v1112_v22, %v1110_v20  ;;  %s2877_s12 = scalar_lea.vmem %s2206_s2, 128  ;;  %p2882_p1 = scmp.lt.s32.totalorder %s2206_s2, %s2206_s2 }
  0x13   :  { %168 = vmatprep.mubr.f32.mxu0 %v2901_v3  ;;  %2346 = vmatpush1.bf16.msra.mxu0 %v3039_v30  ;;  %p2878_p0 = scmp.ne.s32.totalorder %s2206_s2, %s2877_s12  ;;  %p2883_p2 = scmp.lt.s32.totalorder %s2877_s12, %s2877_s12 }
  0x14   :  { %2348 = vmatprep.subr.bf16.mxu0 %v2966_v8 }
  0x15   :  { %2466 = vmatpush1.bf16.msra.mxu1 %v2465_v63  ;;  %p2884_p3 = por %p2883_p2, %p2882_p1 }
  0x16   :  { %2226 = vmatmul.mubr.msk.f32.gmra.mrb[8].mxu0 %vm50_vm1, %v31_v31  ;;  %2468 = vmatprep.subr.bf16.mxu1 %v2467_v11 }
  0x17   :  { %174 = vmatprep.mubr.f32.mxu0 %v2901_v3  ;;  %p2885_p4 = pnand %p2884_p3, %p2878_p0 }
  0x19   :  { %2470 = vmatpush1.bf16.msra.mxu1 %v2469_v15 }
  0x1a   :  { %2227 = vmatmul.mubr.msk.f32.gmra.mrb[10].mxu0 %vm50_vm1, %v32_v32  ;;  %2472 = vmatprep.subr.bf16.mxu1 %v2471_v21 }
  0x1b   :  { %180 = vmatprep.mubr.f32.mxu0 %v2901_v3 }
  0x1d   :  { %2474 = vmatpush1.bf16.msra.mxu1 %v2473_v23 }
  0x1e   :  { %2228 = vmatmul.mubr.msk.f32.gmra.mrb[12].mxu0 %vm50_vm1, %v33_v33 }
  0x1f   :  { %186 = vmatprep.mubr.f32.mxu0 %v2901_v3 }
  0x22   :  { %2229 = vmatmul.mubr.msk.f32.gmra.mrb[14].mxu0 %vm50_vm1, %v34_v34 }
  0x23   :  { %298 = vmatprep.mubr.f32.mxu0 %v2901_v3 }
  0x26   :  { %299 = vmatmul.mubr.f32.vlgmr.msra.gmra.mrb[0].mxu0 %v2901_v3 }
  0x27   :  { %2350 = vmatpush1.bf16.msra.mxu0 %v2968_v9  ;;  %405 = vmatprep.mubr.f32.mxu0 %v2901_v3 }
  0x28   :  { %2352 = vmatprep.subr.bf16.mxu0 %v2984_v14 }
  0x2b   :  { %2354 = vmatpush1.bf16.msra.mxu0 %v2999_v18 }
  0x2c   :  { %2356 = vmatprep.subr.bf16.mxu0 %v3002_v19 }
  0x2f   :  { %2358 = vmatpush1.bf16.msra.mxu0 %v3022_v25 }
  0x30   :  { %2360 = vmatprep.subr.bf16.mxu0 %v3025_v26 }
  0x33   :  { %2362 = vmatpush1.bf16.msra.mxu0 %v3039_v30 }
  0x34   :  { %2364 = vmatprep.subr.bf16.mxu0 %v2966_v8 }
  0xf9   :  { %v300_v40 = vpop.f32.mrb[0].mxu0 }
  0xfa   :  { %v2615_v41 = vadd.f32 %v300_v40, %v3084_v39  ;;  %v302_v42 = vpop.f32.mrb[1].mxu0 }
  0xfb   :  { %v2616_v46 = vadd.f32 %v302_v42, %v3090_v45 }
  0xfc   :  { %v2230_v43 = vmul.f32 -1.442695, %v2615_v41 }
  0xfd   :  { %v2231_v0 = vmul.f32 -1.442695, %v2616_v46 }
  0xfe   :  { %2685 = vpow2.f32 %v2230_v43 }
  0xff   :  { %2687 = vtanh.f32 %v2616_v46 }
 0x108   :  { %v2686_v47 = vpop.eup %2685 }
 0x109   :  { %v313_v48 = vadd.f32 1.0, %v2686_v47  ;;  %v2688_v49 = vpop.eup %2687 }
 0x10b   :  { %2689 = vrcp.f32 %v313_v48 }
 0x10c   :  { %2691 = vpow2.f32 %v2231_v0 }
 0x115   :  { %v2690_v50 = vpop.eup %2689 }
 0x116   :  { %v321_v51 = vmul.f32 %v2690_v50, %v2688_v49  ;;  %v2692_v1 = vpop.eup %2691  ;;  %v320_v4 = vmul.f32 0.0, %v2690_v50 }
 0x117   :  { %v314_v2 = vadd.f32 1.0, %v2692_v1 }
 0x118   :  { %323 = vrot.lane.b32.xlu0 %v321_v51, %s2902_s27 }
 0x119   :  { %2693 = vrcp.f32 %v314_v2 }
 0x123   :  { %v2694_v24 = vpop.eup %2693 }
 0x18a   :  { %v324_v5 = vpop.permute.xlu0 %323 }
 0x18b   :  { %v326_v10 = vadd.f32 %v324_v5, %v320_v4 }
 0x18d   :  { %2695 = vtanh.f32 %v326_v10 }
 0x197   :  { %v2696_v27 = vpop.eup %2695 }
 0x198   :  { %v328_v28 = vmul.f32 %v2696_v27, %v2694_v24 }
 0x19a   :  { %330 = vrot.lane.b32.xlu0 %v328_v28, %s2902_s27 }
 0x20c   :  { %v331_v29 = vpop.permute.xlu0 %330 }
 0x20d   :  { %333 = vst.msk [vmem:[#allocation2] sm:$0xff] %vm230_vm2, %v331_v29  ;;  %2232 = vmatmul.mubr.msk.f32.vlgmr.msra.gmra.mrb[2].mxu0 %vm230_vm2, %v331_v29 }
 0x20e   :  { %2366 = vmatpush1.bf16.msra.mxu0 %v2968_v9  ;;  %513 = vmatprep.mubr.f32.mxu0 %v2901_v3 }
 0x20f   :  { %2368 = vmatprep.subr.bf16.mxu0 %v2984_v14 }
 0x212   :  { %2370 = vmatpush1.bf16.msra.mxu0 %v2999_v18 }
 0x213   :  { %2372 = vmatprep.subr.bf16.mxu0 %v3002_v19 }
 0x214   :  { %v1090_v31 = vld [vmem:[#allocation2] sm:$0xff] }
 0x215   :  { %2254 = vmatmul.mubr.msk.f32.vlgmr.msra.gmra.mrb[0].mxu1 %vm230_vm2, %v1090_v31 }
 0x216   :  { %2374 = vmatpush1.bf16.msra.mxu0 %v3022_v25  ;;  %1221 = vmatprep.mubr.f32.mxu1 %v2901_v3 }
 0x217   :  { %2376 = vmatprep.subr.bf16.mxu0 %v3025_v26 }
 0x21a   :  { %2378 = vmatpush1.bf16.msra.mxu0 %v3039_v30 }
 0x21b   :  { %2380 = vmatprep.subr.bf16.mxu0 %v2966_v8 }
 0x2e0   :  { %v407_v32 = vpop.f32.mrb[2].mxu0 }
 0x2e1   :  { %v2617_v33 = vadd.f32 %v407_v32, %v3084_v39  ;;  %v409_v34 = vpop.f32.mrb[3].mxu0 }
 0x2e2   :  { %v2618_v38 = vadd.f32 %v409_v34, %v3090_v45 }
 0x2e3   :  { %v2233_v35 = vmul.f32 -1.442695, %v2617_v33 }
 0x2e4   :  { %v2234_v47 = vmul.f32 -1.442695, %v2618_v38 }
 0x2e5   :  { %2697 = vpow2.f32 %v2233_v35 }
 0x2e6   :  { %2699 = vtanh.f32 %v2618_v38 }
 0x2ef   :  { %v2698_v40 = vpop.eup %2697 }
 0x2f0   :  { %v420_v41 = vadd.f32 1.0, %v2698_v40  ;;  %v2700_v42 = vpop.eup %2699 }
 0x2f2   :  { %2701 = vrcp.f32 %v420_v41 }
 0x2f3   :  { %2703 = vpow2.f32 %v2234_v47 }
 0x2fc   :  { %v2702_v43 = vpop.eup %2701 }
 0x2fd   :  { %v428_v46 = vmul.f32 %v2702_v43, %v2700_v42  ;;  %v2704_v48 = vpop.eup %2703  ;;  %v427_v50 = vmul.f32 %v2702_v43, %v326_v10 }
 0x2fe   :  { %v421_v49 = vadd.f32 1.0, %v2704_v48 }
 0x2ff   :  { %430 = vrot.lane.b32.xlu1 %v428_v46, %s2902_s27 }
 0x300   :  { %2705 = vrcp.f32 %v421_v49 }
 0x30a   :  { %v2706_v53 = vpop.eup %2705 }
 0x371   :  { %v431_v51 = vpop.permute.xlu1 %430 }
 0x372   :  { %v433_v52 = vadd.f32 %v431_v51, %v427_v50 }
 0x374   :  { %2707 = vtanh.f32 %v433_v52 }
 0x37e   :  { %v2708_v54 = vpop.eup %2707 }
 0x37f   :  { %v435_v55 = vmul.f32 %v2708_v54, %v2706_v53 }
 0x381   :  { %437 = vrot.lane.b32.xlu1 %v435_v55, %s2902_s27 }
 0x3f3   :  { %v438_v56 = vpop.permute.xlu1 %437 }
 0x3f4   :  { %441 = vst.msk [vmem:[#allocation2 + $0x8] sm:$0xff] %vm230_vm2, %v438_v56  ;;  %2235 = vmatmul.mubr.msk.f32.vlgmr.msra.gmra.mrb[4].mxu0 %vm230_vm2, %v438_v56 }
 0x3f5   :  { %2382 = vmatpush1.bf16.msra.mxu0 %v2968_v9  ;;  %621 = vmatprep.mubr.f32.mxu0 %v2901_v3 }
 0x3f6   :  { %2384 = vmatprep.subr.bf16.mxu0 %v2984_v14 }
 0x3f9   :  { %2386 = vmatpush1.bf16.msra.mxu0 %v2999_v18 }
 0x3fa   :  { %2388 = vmatprep.subr.bf16.mxu0 %v3002_v19 }
 0x3fb   :  { %v1091_v57 = vld [vmem:[#allocation2 + $0x8] sm:$0xff] }
 0x3fc   :  { %2255 = vmatmul.mubr.msk.f32.gmra.mrb[2].mxu1 %vm230_vm2, %v1091_v57 }
 0x3fd   :  { %2390 = vmatpush1.bf16.msra.mxu0 %v3022_v25  ;;  %1227 = vmatprep.mubr.f32.mxu1 %v2901_v3 }
 0x3fe   :  { %2392 = vmatprep.subr.bf16.mxu0 %v3025_v26 }
 0x401   :  { %2394 = vmatpush1.bf16.msra.mxu0 %v3039_v30 }
 0x402   :  { %2396 = vmatprep.subr.bf16.mxu0 %v2966_v8 }
 0x4c7   :  { %v515_v58 = vpop.f32.mrb[4].mxu0 }
 0x4c8   :  { %v2619_v59 = vadd.f32 %v515_v58, %v3084_v39  ;;  %v517_v60 = vpop.f32.mrb[5].mxu0 }
 0x4c9   :  { %v2620_v62 = vadd.f32 %v517_v60, %v3090_v45 }
 0x4ca   :  { %v2236_v61 = vmul.f32 -1.442695, %v2619_v59 }
 0x4cb   :  { %v2237_v5 = vmul.f32 -1.442695, %v2620_v62 }
 0x4cc   :  { %2709 = vpow2.f32 %v2236_v61 }
 0x4cd   :  { %2711 = vtanh.f32 %v2620_v62 }
 0x4d6   :  { %v2710_v63 = vpop.eup %2709 }
 0x4d7   :  { %v528_v0 = vadd.f32 1.0, %v2710_v63  ;;  %v2712_v1 = vpop.eup %2711 }
 0x4d9   :  { %2713 = vrcp.f32 %v528_v0 }
 0x4da   :  { %2715 = vpow2.f32 %v2237_v5 }
 0x4e3   :  { %v2714_v2 = vpop.eup %2713 }
 0x4e4   :  { %v536_v4 = vmul.f32 %v2714_v2, %v2712_v1  ;;  %v2716_v6 = vpop.eup %2715  ;;  %v535_v10 = vmul.f32 %v2714_v2, %v433_v52 }
 0x4e5   :  { %v529_v7 = vadd.f32 1.0, %v2716_v6 }
 0x4e6   :  { %538 = vrot.lane.b32.xlu0 %v536_v4, %s2902_s27 }
 0x4e7   :  { %2717 = vrcp.f32 %v529_v7 }
 0x4f1   :  { %v2718_v13 = vpop.eup %2717 }
 0x558   :  { %v539_v11 = vpop.permute.xlu0 %538 }
 0x559   :  { %v541_v12 = vadd.f32 %v539_v11, %v535_v10 }
 0x55b   :  { %2719 = vtanh.f32 %v541_v12 }
 0x565   :  { %v2720_v15 = vpop.eup %2719 }
 0x566   :  { %v543_v16 = vmul.f32 %v2720_v15, %v2718_v13 }
 0x568   :  { %545 = vrot.lane.b32.xlu1 %v543_v16, %s2902_s27 }
 0x5da   :  { %v546_v17 = vpop.permute.xlu1 %545 }
 0x5db   :  { %549 = vst.msk [vmem:[#allocation2 + $0x10] sm:$0xff] %vm230_vm2, %v546_v17  ;;  %2238 = vmatmul.mubr.msk.f32.vlgmr.msra.gmra.mrb[6].mxu0 %vm230_vm2, %v546_v17 }
 0x5dc   :  { %2398 = vmatpush1.bf16.msra.mxu0 %v2968_v9  ;;  %729 = vmatprep.mubr.f32.mxu0 %v2901_v3 }
 0x5dd   :  { %2400 = vmatprep.subr.bf16.mxu0 %v2984_v14 }
 0x5e0   :  { %2402 = vmatpush1.bf16.msra.mxu0 %v2999_v18 }
 0x5e1   :  { %2404 = vmatprep.subr.bf16.mxu0 %v3002_v19 }
 0x5e2   :  { %v1092_v20 = vld [vmem:[#allocation2 + $0x10] sm:$0xff] }
 0x5e3   :  { %2256 = vmatmul.mubr.msk.f32.gmra.mrb[4].mxu1 %vm230_vm2, %v1092_v20 }
 0x5e4   :  { %2406 = vmatpush1.bf16.msra.mxu0 %v3022_v25  ;;  %1233 = vmatprep.mubr.f32.mxu1 %v2901_v3 }
 0x5e5   :  { %2408 = vmatprep.subr.bf16.mxu0 %v3025_v26 }
 0x5e8   :  { %2410 = vmatpush1.bf16.msra.mxu0 %v3039_v30 }
 0x5e9   :  { %2412 = vmatprep.subr.bf16.mxu0 %v2966_v8 }
 0x6ae   :  { %v623_v21 = vpop.f32.mrb[6].mxu0 }
 0x6af   :  { %v2621_v22 = vadd.f32 %v623_v21, %v3084_v39  ;;  %v625_v23 = vpop.f32.mrb[7].mxu0 }
 0x6b0   :  { %v2622_v27 = vadd.f32 %v625_v23, %v3090_v45 }
 0x6b1   :  { %v2239_v24 = vmul.f32 -1.442695, %v2621_v22 }
 0x6b2   :  { %v2240_v34 = vmul.f32 -1.442695, %v2622_v27 }
 0x6b3   :  { %2721 = vpow2.f32 %v2239_v24 }
 0x6b4   :  { %2723 = vtanh.f32 %v2622_v27 }
 0x6bd   :  { %v2722_v28 = vpop.eup %2721 }
 0x6be   :  { %v636_v29 = vadd.f32 1.0, %v2722_v28  ;;  %v2724_v31 = vpop.eup %2723 }
 0x6c0   :  { %2725 = vrcp.f32 %v636_v29 }
 0x6c1   :  { %2727 = vpow2.f32 %v2240_v34 }
 0x6ca   :  { %v2726_v32 = vpop.eup %2725 }
 0x6cb   :  { %v644_v33 = vmul.f32 %v2726_v32, %v2724_v31  ;;  %v2728_v35 = vpop.eup %2727  ;;  %v643_v40 = vmul.f32 %v2726_v32, %v541_v12 }
 0x6cc   :  { %v637_v38 = vadd.f32 1.0, %v2728_v35 }
 0x6cd   :  { %646 = vrot.lane.b32.xlu0 %v644_v33, %s2902_s27 }
 0x6ce   :  { %2729 = vrcp.f32 %v637_v38 }
 0x6d8   :  { %v2730_v43 = vpop.eup %2729 }
 0x73f   :  { %v647_v41 = vpop.permute.xlu0 %646 }
 0x740   :  { %v649_v42 = vadd.f32 %v647_v41, %v643_v40 }
 0x742   :  { %2731 = vtanh.f32 %v649_v42 }
 0x74c   :  { %v2732_v46 = vpop.eup %2731 }
 0x74d   :  { %v651_v47 = vmul.f32 %v2732_v46, %v2730_v43 }
 0x74f   :  { %653 = vrot.lane.b32.xlu1 %v651_v47, %s2902_s27 }
 0x7c1   :  { %v654_v48 = vpop.permute.xlu1 %653 }
 0x7c2   :  { %657 = vst.msk [vmem:[#allocation2 + $0x18] sm:$0xff] %vm230_vm2, %v654_v48  ;;  %2241 = vmatmul.mubr.msk.f32.vlgmr.msra.gmra.mrb[8].mxu0 %vm230_vm2, %v654_v48 }
 0x7c3   :  { %2414 = vmatpush1.bf16.msra.mxu0 %v2968_v9  ;;  %837 = vmatprep.mubr.f32.mxu0 %v2901_v3 }
 0x7c4   :  { %2416 = vmatprep.subr.bf16.mxu0 %v2984_v14 }
 0x7c7   :  { %2418 = vmatpush1.bf16.msra.mxu0 %v2999_v18 }
 0x7c8   :  { %2420 = vmatprep.subr.bf16.mxu0 %v3002_v19 }
 0x7c9   :  { %v1093_v49 = vld [vmem:[#allocation2 + $0x18] sm:$0xff] }
 0x7ca   :  { %2257 = vmatmul.mubr.msk.f32.gmra.mrb[6].mxu1 %vm230_vm2, %v1093_v49 }
 0x7cb   :  { %2422 = vmatpush1.bf16.msra.mxu0 %v3022_v25  ;;  %1239 = vmatprep.mubr.f32.mxu1 %v2901_v3 }
 0x7cc   :  { %2424 = vmatprep.subr.bf16.mxu0 %v3025_v26 }
 0x7cf   :  { %2426 = vmatpush1.bf16.msra.mxu0 %v3039_v30 }
 0x7d0   :  { %2428 = vmatprep.subr.bf16.mxu0 %v2966_v8 }
 0x895   :  { %v731_v50 = vpop.f32.mrb[8].mxu0 }
 0x896   :  { %v2623_v51 = vadd.f32 %v731_v50, %v3084_v39  ;;  %v733_v52 = vpop.f32.mrb[9].mxu0 }
 0x897   :  { %v2624_v54 = vadd.f32 %v733_v52, %v3090_v45 }
 0x898   :  { %v2242_v53 = vmul.f32 -1.442695, %v2623_v51 }
 0x899   :  { %v2243_v60 = vmul.f32 -1.442695, %v2624_v54 }
 0x89a   :  { %2733 = vpow2.f32 %v2242_v53 }
 0x89b   :  { %2735 = vtanh.f32 %v2624_v54 }
 0x8a4   :  { %v2734_v55 = vpop.eup %2733 }
 0x8a5   :  { %v744_v56 = vadd.f32 1.0, %v2734_v55  ;;  %v2736_v57 = vpop.eup %2735 }
 0x8a7   :  { %2737 = vrcp.f32 %v744_v56 }
 0x8a8   :  { %2739 = vpow2.f32 %v2243_v60 }
 0x8b1   :  { %v2738_v58 = vpop.eup %2737 }
 0x8b2   :  { %v752_v59 = vmul.f32 %v2738_v58, %v2736_v57  ;;  %v2740_v61 = vpop.eup %2739  ;;  %v751_v63 = vmul.f32 %v2738_v58, %v649_v42 }
 0x8b3   :  { %v745_v62 = vadd.f32 1.0, %v2740_v61 }
 0x8b4   :  { %754 = vrot.lane.b32.xlu0 %v752_v59, %s2902_s27 }
 0x8b5   :  { %2741 = vrcp.f32 %v745_v62 }
 0x8bf   :  { %v2742_v2 = vpop.eup %2741 }
 0x926   :  { %v755_v0 = vpop.permute.xlu0 %754 }
 0x927   :  { %v757_v1 = vadd.f32 %v755_v0, %v751_v63 }
 0x929   :  { %2743 = vtanh.f32 %v757_v1 }
 0x933   :  { %v2744_v4 = vpop.eup %2743 }
 0x934   :  { %v759_v5 = vmul.f32 %v2744_v4, %v2742_v2  ;;  %v2264_v4 = vld [vmem:[%s3485_s3 + $0x90] sm:$0xff] }
 0x936   :  { %761 = vrot.lane.b32.xlu1 %v759_v5, %s2902_s27  ;;  %v2267_v5 = vld [vmem:[%s3485_s3 + $0xa8] sm:$0xff] }
 0x9a8   :  { %v762_v6 = vpop.permute.xlu1 %761 }
 0x9a9   :  { %765 = vst.msk [vmem:[#allocation2 + $0x20] sm:$0xff] %vm230_vm2, %v762_v6  ;;  %2244 = vmatmul.mubr.msk.f32.vlgmr.msra.gmra.mrb[10].mxu0 %vm230_vm2, %v762_v6  ;;  %v2269_v6 = vld [vmem:[%s3485_s3 + $0xb8] sm:$0xff] }
 0x9aa   :  { %2430 = vmatpush1.bf16.msra.mxu0 %v2968_v9  ;;  %945 = vmatprep.mubr.f32.mxu0 %v2901_v3 }
 0x9ab   :  { %2432 = vmatprep.subr.bf16.mxu0 %v2984_v14 }
 0x9ae   :  { %2434 = vmatpush1.bf16.msra.mxu0 %v2999_v18 }
 0x9af   :  { %2436 = vmatprep.subr.bf16.mxu0 %v3002_v19 }
 0x9b0   :  { %v1094_v7 = vld [vmem:[#allocation2 + $0x20] sm:$0xff] }
 0x9b1   :  { %2258 = vmatmul.mubr.msk.f32.gmra.mrb[8].mxu1 %vm230_vm2, %v1094_v7 }
 0x9b2   :  { %2438 = vmatpush1.bf16.msra.mxu0 %v3022_v25  ;;  %1245 = vmatprep.mubr.f32.mxu1 %v2901_v3 }
 0x9b3   :  { %2440 = vmatprep.subr.bf16.mxu0 %v3025_v26 }
 0x9b6   :  { %2442 = vmatpush1.bf16.msra.mxu0 %v3039_v30 }
 0x9b7   :  { %2444 = vmatprep.subr.bf16.mxu0 %v2966_v8 }
 0xa7c   :  { %v839_v10 = vpop.f32.mrb[10].mxu0 }
 0xa7d   :  { %v2625_v11 = vadd.f32 %v839_v10, %v3084_v39  ;;  %v841_v12 = vpop.f32.mrb[11].mxu0  ;;  %v3273_v10 = vpack.c.bf16 %v2269_v6, %v2267_v5 }
 0xa7e   :  { %v2626_v15 = vadd.f32 %v841_v12, %v3090_v45  ;;  %v2268_v12 = vld [vmem:[%s3485_s3 + $0xb0] sm:$0xff] }
 0xa7f   :  { %v2245_v13 = vmul.f32 -1.442695, %v2625_v11  ;;  %v2266_v11 = vld [vmem:[%s3485_s3 + $0xa0] sm:$0xff] }
 0xa80   :  { %v2246_v23 = vmul.f32 -1.442695, %v2626_v15 }
 0xa81   :  { %2745 = vpow2.f32 %v2245_v13  ;;  %v2271_v13 = vld [vmem:[%s3485_s3 + $0xc8] sm:$0xff] }
 0xa82   :  { %2747 = vtanh.f32 %v2626_v15  ;;  %v2273_v15 = vld [vmem:[%s3485_s3 + $0xd8] sm:$0xff] }
 0xa8b   :  { %v2746_v16 = vpop.eup %2745 }
 0xa8c   :  { %v852_v17 = vadd.f32 1.0, %v2746_v16  ;;  %v2748_v20 = vpop.eup %2747  ;;  %v3289_v16 = vpack.c.bf16 %v2268_v12, %v2266_v11 }
 0xa8e   :  { %2749 = vrcp.f32 %v852_v17  ;;  %v3292_v17 = vpack.c.bf16 %v2273_v15, %v2271_v13 }
 0xa8f   :  { %2751 = vpow2.f32 %v2246_v23 }
 0xa98   :  { %v2750_v21 = vpop.eup %2749 }
 0xa99   :  { %v860_v22 = vmul.f32 %v2750_v21, %v2748_v20  ;;  %v2752_v8 = vpop.eup %2751  ;;  %v859_v27 = vmul.f32 %v2750_v21, %v757_v1  ;;  %v2263_v1 = vld [vmem:[%s3485_s3 + $0x88] sm:$0xff]  ;;  %v2270_v20 = vld [vmem:[%s3485_s3 + $0xc0] sm:$0xff]  ;;  %v2272_v21 = vld [vmem:[%s3485_s3 + $0xd0] sm:$0xff] }
 0xa9a   :  { %v853_v24 = vadd.f32 1.0, %v2752_v8 }
 0xa9b   :  { %862 = vrot.lane.b32.xlu0 %v860_v22, %s2902_s27  ;;  %v3301_v22 = vpack.c.bf16 %v2272_v21, %v2270_v20 }
 0xa9c   :  { %2753 = vrcp.f32 %v853_v24 }
 0xaa6   :  { %v2754_v31 = vpop.eup %2753 }
 0xb0d   :  { %v863_v28 = vpop.permute.xlu0 %862 }
 0xb0e   :  { %v865_v29 = vadd.f32 %v863_v28, %v859_v27 }
 0xb10   :  { %2755 = vtanh.f32 %v865_v29 }
 0xb1a   :  { %v2756_v32 = vpop.eup %2755 }
 0xb1b   :  { %v867_v33 = vmul.f32 %v2756_v32, %v2754_v31  ;;  %v2275_v31 = vld [vmem:[%s3485_s3 + $0xe8] sm:$0xff]  ;;  %v2277_v32 = vld [vmem:[%s3485_s3 + $0xf8] sm:$0xff] }
 0xb1d   :  { %869 = vrot.lane.b32.xlu1 %v867_v33, %s2902_s27  ;;  %v2274_v33 = vld [vmem:[%s3485_s3 + $0xe0] sm:$0xff] }
 0xb8f   :  { %v870_v34 = vpop.permute.xlu1 %869 }
 0xb90   :  { %873 = vst.msk [vmem:[#allocation2 + $0x28] sm:$0xff] %vm230_vm2, %v870_v34  ;;  %2247 = vmatmul.mubr.msk.f32.vlgmr.msra.gmra.mrb[12].mxu0 %vm230_vm2, %v870_v34  ;;  %v3314_v34 = vpack.c.bf16 %v2277_v32, %v2275_v31 }
 0xb91   :  { %2446 = vmatpush1.bf16.msra.mxu0 %v2968_v9  ;;  %1053 = vmatprep.mubr.f32.mxu0 %v2901_v3 }
 0xb92   :  { %2448 = vmatprep.subr.bf16.mxu0 %v2984_v14 }
 0xb95   :  { %2450 = vmatpush1.bf16.msra.mxu0 %v2999_v18 }
 0xb96   :  { %2452 = vmatprep.subr.bf16.mxu0 %v3002_v19 }
 0xb97   :  { %v1095_v35 = vld [vmem:[#allocation2 + $0x28] sm:$0xff] }
 0xb98   :  { %2259 = vmatmul.mubr.msk.f32.gmra.mrb[10].mxu1 %vm230_vm2, %v1095_v35  ;;  %v2276_v35 = vld [vmem:[%s3485_s3 + $0xf0] sm:$0xff] }
 0xb99   :  { %2454 = vmatpush1.bf16.msra.mxu0 %v3022_v25  ;;  %1251 = vmatprep.mubr.f32.mxu1 %v2901_v3 }
 0xb9a   :  { %2456 = vmatprep.subr.bf16.mxu0 %v3025_v26 }
 0xb9d   :  { %2458 = vmatpush1.bf16.msra.mxu0 %v3039_v30 }
 0xc63   :  { %v947_v9 = vpop.f32.mrb[12].mxu0 }
 0xc64   :  { %v2627_v38 = vadd.f32 %v947_v9, %v3084_v39  ;;  %v949_v40 = vpop.f32.mrb[13].mxu0  ;;  %v3319_v9 = vpack.c.bf16 %v2276_v35, %v2274_v33 }
 0xc65   :  { %v2628_v18 = vadd.f32 %v949_v40, %v3090_v45 }
 0xc66   :  { %v2248_v14 = vmul.f32 -1.442695, %v2627_v38 }
 0xc67   :  { %v2249_v26 = vmul.f32 -1.442695, %v2628_v18 }
 0xc68   :  { %2757 = vpow2.f32 %v2248_v14 }
 0xc69   :  { %2759 = vtanh.f32 %v2628_v18 }
 0xc72   :  { %v2758_v19 = vpop.eup %2757 }
 0xc73   :  { %v960_v41 = vadd.f32 1.0, %v2758_v19  ;;  %v2760_v42 = vpop.eup %2759 }
 0xc75   :  { %2761 = vrcp.f32 %v960_v41  ;;  %v2253_v41 = vld [vmem:[%s3486_s4 + $0x2] sm:$0x3] }
 0xc76   :  { %2763 = vpow2.f32 %v2249_v26 }
 0xc7f   :  { %v2762_v25 = vpop.eup %2761 }
 0xc80   :  { %v968_v43 = vmul.f32 %v2762_v25, %v2760_v42  ;;  %v2764_v30 = vpop.eup %2763  ;;  %v967_v47 = vmul.f32 %v2762_v25, %v865_v29  ;;  %v3343_v42 = vrot.slane %v2253_v41, %v40_v37 }
 0xc81   :  { %v961_v46 = vadd.f32 1.0, %v2764_v30 }
 0xc82   :  { %970 = vrot.lane.b32.xlu0 %v968_v43, %s2902_s27 }
 0xc83   :  { %2765 = vrcp.f32 %v961_v46  ;;  %v3348_v46 = vrot.slane %v2253_v41, %v44_v44 }
 0xc8d   :  { %v2766_v50 = vpop.eup %2765 }
 0xcf4   :  { %v971_v48 = vpop.permute.xlu0 %970 }
 0xcf5   :  { %v973_v49 = vadd.f32 %v971_v48, %v967_v47 }
 0xcf7   :  { %2767 = vtanh.f32 %v973_v49 }
 0xd01   :  { %v2768_v51 = vpop.eup %2767 }
 0xd02   :  { %v975_v52 = vmul.f32 %v2768_v51, %v2766_v50 }
 0xd04   :  { %977 = vrot.lane.b32.xlu1 %v975_v52, %s2902_s27 }
 0xd76   :  { %v978_v53 = vpop.permute.xlu1 %977 }
 0xd77   :  { %981 = vst.msk [vmem:[#allocation2 + $0x30] sm:$0xff] %vm230_vm2, %v978_v53  ;;  %2250 = vmatmul.mubr.msk.f32.vlgmr.msra.gmra.mrb[14].mxu0 %vm230_vm2, %v978_v53 }
 0xd78   :  { %2328 = vmatprep.mubr.msk.f32.mxu0 %vm2904_vm3, %v2901_v3 }
 0xd7e   :  { %v1096_v54 = vld [vmem:[#allocation2 + $0x30] sm:$0xff] }
 0xd7f   :  { %2260 = vmatmul.mubr.msk.f32.gmra.mrb[12].mxu1 %vm230_vm2, %v1096_v54 }
 0xd80   :  { %1257 = vmatprep.mubr.f32.mxu1 %v2901_v3 }
 0xe4a   :  { %v1055_v55 = vpop.f32.mrb[14].mxu0 }
 0xe4b   :  { %v2629_v56 = vadd.f32 %v1055_v55, %v3084_v39  ;;  %v1057_v57 = vpop.f32.mrb[15].mxu0  ;;  %v2265_v39 = vld [vmem:[%s3485_s3 + $0x98] sm:$0xff] }
 0xe4c   :  { %v2630_v59 = vadd.f32 %v1057_v57, %v3090_v45  ;;  %v2262_v45 = vld [vmem:[%s3485_s3 + $0x80] sm:$0xff]  ;;  %v3260_v2 = vpack.c.bf16 %v2265_v39, %v2263_v1 }
 0xe4d   :  { %v2251_v58 = vmul.f32 -1.442695, %v2629_v56  ;;  %v3271_v7 = vpack.c.bf16 %v2264_v4, %v2262_v45 }
 0xe4e   :  { %2476 = vmatprep.subr.bf16.mxu1 %v3260_v2  ;;  %v2252_v23 = vmul.f32 -1.442695, %v2630_v59 }
 0xe4f   :  { %2769 = vpow2.f32 %v2251_v58  ;;  %2478 = vmatpush1.bf16.msra.mxu1 %v3271_v7 }
 0xe50   :  { %2771 = vtanh.f32 %v2630_v59  ;;  %2480 = vmatprep.subr.bf16.mxu1 %v3273_v10 }
 0xe53   :  { %2482 = vmatpush1.bf16.msra.mxu1 %v3289_v16 }
 0xe54   :  { %2484 = vmatprep.subr.bf16.mxu1 %v3292_v17 }
 0xe57   :  { %2486 = vmatpush1.bf16.msra.mxu1 %v3301_v22 }
 0xe58   :  { %2488 = vmatprep.subr.bf16.mxu1 %v3314_v34 }
 0xe59   :  { %v2770_v60 = vpop.eup %2769 }
 0xe5a   :  { %v1068_v61 = vadd.f32 1.0, %v2770_v60  ;;  %v2772_v62 = vpop.eup %2771 }
 0xe5b   :  { %2490 = vmatpush1.bf16.msra.mxu1 %v3319_v9 }
 0xe5c   :  { %2773 = vrcp.f32 %v1068_v61  ;;  %2492 = vmatprep.subr.bf16.mxu1 %v3260_v2 }
 0xe5d   :  { %2775 = vpow2.f32 %v2252_v23 }
 0xe66   :  { %v2774_v63 = vpop.eup %2773 }
 0xe67   :  { %v1076_v0 = vmul.f32 %v2774_v63, %v2772_v62  ;;  %v2776_v8 = vpop.eup %2775  ;;  %v1075_v27 = vmul.f32 %v2774_v63, %v973_v49 }
 0xe68   :  { %v1069_v24 = vadd.f32 1.0, %v2776_v8 }
 0xe69   :  { %1078 = vrot.lane.b32.xlu0 %v1076_v0, %s2902_s27 }
 0xe6a   :  { %2777 = vrcp.f32 %v1069_v24 }
 0xe74   :  { %v2778_v38 = vpop.eup %2777 }
 0xedb   :  { %v1079_v28 = vpop.permute.xlu0 %1078 }
 0xedc   :  { %v1081_v29 = vadd.f32 %v1079_v28, %v1075_v27 }
 0xede   :  { %2779 = vtanh.f32 %v1081_v29 }
 0xee8   :  { %v2780_v40 = vpop.eup %2779 }
 0xee9   :  { %v1083_v14 = vmul.f32 %v2780_v40, %v2778_v38 }
 0xeeb   :  { %1085 = vrot.lane.b32.xlu1 %v1083_v14, %s2902_s27 }
 0xf5d   :  { %v1086_v18 = vpop.permute.xlu1 %1085 }
 0xf5e   :  { %1089 = vst.msk [vmem:[#allocation2 + $0x38] sm:$0xff] %vm230_vm2, %v1086_v18 }
 0xf65   :  { %v1097_v19 = vld [vmem:[#allocation2 + $0x38] sm:$0xff] }
 0xf66   :  { %2261 = vmatmul.mubr.msk.f32.gmra.mrb[14].mxu1 %vm230_vm2, %v1097_v19 }
 0xf67   :  { %1363 = vmatprep.mubr.f32.mxu1 %v2901_v3 }
 0xf6a   :  { %1364 = vmatmul.mubr.f32.vlgmr.msra.gmra.mrb[0].mxu1 %v2901_v3 }
 0xf6b   :  { %2494 = vmatpush1.bf16.msra.mxu1 %v3271_v7  ;;  %1465 = vmatprep.mubr.f32.mxu1 %v2901_v3 }
 0xf6c   :  { %2496 = vmatprep.subr.bf16.mxu1 %v3273_v10 }
 0xf6f   :  { %2498 = vmatpush1.bf16.msra.mxu1 %v3289_v16 }
 0xf70   :  { %2500 = vmatprep.subr.bf16.mxu1 %v3292_v17 }
 0xf73   :  { %2502 = vmatpush1.bf16.msra.mxu1 %v3301_v22 }
 0xf74   :  { %2504 = vmatprep.subr.bf16.mxu1 %v3314_v34 }
 0xf77   :  { %2506 = vmatpush1.bf16.msra.mxu1 %v3319_v9 }
 0xf78   :  { %2508 = vmatprep.subr.bf16.mxu1 %v3260_v2 }
0x103d   :  { %v1365_v25 = vpop.f32.mrb[0].mxu1 }
0x103e   :  { %v2631_v43 = vadd.f32 %v1365_v25, %v3343_v42  ;;  %v1367_v26 = vpop.f32.mrb[1].mxu1 }
0x103f   :  { %v2632_v47 = vadd.f32 %v1367_v26, %v3348_v46 }
0x1040   :  { %v2278_v30 = vmul.f32 -1.442695, %v2631_v43 }
0x1041   :  { %v2279_v52 = vmul.f32 -1.442695, %v2632_v47 }
0x1042   :  { %2781 = vpow2.f32 %v2278_v30 }
0x1043   :  { %2783 = vtanh.f32 %v2632_v47 }
0x104c   :  { %v2782_v48 = vpop.eup %2781 }
0x104d   :  { %v1378_v49 = vadd.f32 1.0, %v2782_v48  ;;  %v2784_v50 = vpop.eup %2783 }
0x104f   :  { %2785 = vrcp.f32 %v1378_v49 }
0x1050   :  { %2787 = vpow2.f32 %v2279_v52 }
0x1059   :  { %v2786_v51 = vpop.eup %2785 }
0x105a   :  { %v1386_v37 = vmul.f32 %v2786_v51, %v2784_v50  ;;  %v2788_v53 = vpop.eup %2787  ;;  %v1385_v55 = vmul.f32 0.0, %v2786_v51 }
0x105b   :  { %v1379_v54 = vadd.f32 1.0, %v2788_v53 }
0x105c   :  { %1388 = vrot.lane.b32.xlu0 %v1386_v37, %s2902_s27 }
0x105d   :  { %2789 = vrcp.f32 %v1379_v54 }
0x1067   :  { %v2790_v44 = vpop.eup %2789 }
0x10ce   :  { %v1389_v56 = vpop.permute.xlu0 %1388 }
0x10cf   :  { %v1391_v36 = vadd.f32 %v1389_v56, %v1385_v55 }
0x10d1   :  { %2791 = vtanh.f32 %v1391_v36 }
0x10db   :  { %v2792_v57 = vpop.eup %2791 }
0x10dc   :  { %v1393_v58 = vmul.f32 %v2792_v57, %v2790_v44 }
0x10de   :  { %1397 = vrot.lane.b32.xlu1 %v1393_v58, %s2902_s27 }
0x1150   :  { %v1398_v59 = vpop.permute.xlu1 %1397 }
0x1151   :  { %2280 = vmatmul.mubr.msk.f32.vlgmr.msra.gmra.mrb[2].mxu1 %vm230_vm2, %v1398_v59 }
0x1152   :  { %2510 = vmatpush1.bf16.msra.mxu1 %v3271_v7  ;;  %1567 = vmatprep.mubr.f32.mxu1 %v2901_v3 }
0x1153   :  { %2512 = vmatprep.subr.bf16.mxu1 %v3273_v10 }
0x1156   :  { %2514 = vmatpush1.bf16.msra.mxu1 %v3289_v16 }
0x1157   :  { %2516 = vmatprep.subr.bf16.mxu1 %v3292_v17 }
0x115a   :  { %2518 = vmatpush1.bf16.msra.mxu1 %v3301_v22 }
0x115b   :  { %2520 = vmatprep.subr.bf16.mxu1 %v3314_v34 }
0x115e   :  { %2522 = vmatpush1.bf16.msra.mxu1 %v3319_v9 }
0x115f   :  { %2524 = vmatprep.subr.bf16.mxu1 %v3260_v2 }
0x1224   :  { %v1467_v60 = vpop.f32.mrb[2].mxu1 }
0x1225   :  { %v2633_v61 = vadd.f32 %v1467_v60, %v3343_v42  ;;  %v1469_v62 = vpop.f32.mrb[3].mxu1 }
0x1226   :  { %v2634_v0 = vadd.f32 %v1469_v62, %v3348_v46 }
0x1227   :  { %v2281_v63 = vmul.f32 -1.442695, %v2633_v61 }
0x1228   :  { %v2282_v6 = vmul.f32 -1.442695, %v2634_v0 }
0x1229   :  { %2793 = vpow2.f32 %v2281_v63 }
0x122a   :  { %2795 = vtanh.f32 %v2634_v0 }
0x1233   :  { %v2794_v1 = vpop.eup %2793 }
0x1234   :  { %v1480_v39 = vadd.f32 1.0, %v2794_v1  ;;  %v2796_v45 = vpop.eup %2795 }
0x1236   :  { %2797 = vrcp.f32 %v1480_v39 }
0x1237   :  { %2799 = vpow2.f32 %v2282_v6 }
0x1240   :  { %v2798_v4 = vpop.eup %2797 }
0x1241   :  { %v1488_v5 = vmul.f32 %v2798_v4, %v2796_v45  ;;  %v2800_v11 = vpop.eup %2799  ;;  %v1487_v13 = vmul.f32 %v2798_v4, %v1391_v36 }
0x1242   :  { %v1481_v12 = vadd.f32 1.0, %v2800_v11 }
0x1243   :  { %1490 = vrot.lane.b32.xlu0 %v1488_v5, %s2902_s27 }
0x1244   :  { %2801 = vrcp.f32 %v1481_v12 }
0x124e   :  { %v2802_v21 = vpop.eup %2801 }
0x12b5   :  { %v1491_v15 = vpop.permute.xlu0 %1490 }
0x12b6   :  { %v1493_v20 = vadd.f32 %v1491_v15, %v1487_v13 }
0x12b8   :  { %2803 = vtanh.f32 %v1493_v20 }
0x12c2   :  { %v2804_v23 = vpop.eup %2803 }
0x12c3   :  { %v1495_v8 = vmul.f32 %v2804_v23, %v2802_v21 }
0x12c5   :  { %1499 = vrot.lane.b32.xlu1 %v1495_v8, %s2902_s27 }
0x1337   :  { %v1500_v24 = vpop.permute.xlu1 %1499 }
0x1338   :  { %2283 = vmatmul.mubr.msk.f32.vlgmr.msra.gmra.mrb[4].mxu1 %vm230_vm2, %v1500_v24 }
0x1339   :  { %2526 = vmatpush1.bf16.msra.mxu1 %v3271_v7  ;;  %1669 = vmatprep.mubr.f32.mxu1 %v2901_v3 }
0x133a   :  { %2528 = vmatprep.subr.bf16.mxu1 %v3273_v10 }
0x133d   :  { %2530 = vmatpush1.bf16.msra.mxu1 %v3289_v16 }
0x133e   :  { %2532 = vmatprep.subr.bf16.mxu1 %v3292_v17 }
0x1341   :  { %2534 = vmatpush1.bf16.msra.mxu1 %v3301_v22 }
0x1342   :  { %2536 = vmatprep.subr.bf16.mxu1 %v3314_v34 }
0x1345   :  { %2538 = vmatpush1.bf16.msra.mxu1 %v3319_v9 }
0x1346   :  { %2540 = vmatprep.subr.bf16.mxu1 %v3260_v2 }
0x140b   :  { %v1569_v27 = vpop.f32.mrb[4].mxu1 }
0x140c   :  { %v2635_v28 = vadd.f32 %v1569_v27, %v3343_v42  ;;  %v1571_v29 = vpop.f32.mrb[5].mxu1 }
0x140d   :  { %v2636_v32 = vadd.f32 %v1571_v29, %v3348_v46 }
0x140e   :  { %v2284_v31 = vmul.f32 -1.442695, %v2635_v28 }
0x140f   :  { %v2285_v18 = vmul.f32 -1.442695, %v2636_v32 }
0x1410   :  { %2805 = vpow2.f32 %v2284_v31 }
0x1411   :  { %2807 = vtanh.f32 %v2636_v32 }
0x141a   :  { %v2806_v33 = vpop.eup %2805 }
0x141b   :  { %v1582_v35 = vadd.f32 1.0, %v2806_v33  ;;  %v2808_v38 = vpop.eup %2807 }
0x141d   :  { %2809 = vrcp.f32 %v1582_v35 }
0x141e   :  { %2811 = vpow2.f32 %v2285_v18 }
0x1427   :  { %v2810_v40 = vpop.eup %2809 }
0x1428   :  { %v1590_v14 = vmul.f32 %v2810_v40, %v2808_v38  ;;  %v2812_v19 = vpop.eup %2811  ;;  %v1589_v25 = vmul.f32 %v2810_v40, %v1493_v20 }
0x1429   :  { %v1583_v41 = vadd.f32 1.0, %v2812_v19 }
0x142a   :  { %1592 = vrot.lane.b32.xlu0 %v1590_v14, %s2902_s27 }
0x142b   :  { %2813 = vrcp.f32 %v1583_v41 }
0x1435   :  { %v2814_v30 = vpop.eup %2813 }
0x149c   :  { %v1593_v43 = vpop.permute.xlu0 %1592 }
0x149d   :  { %v1595_v26 = vadd.f32 %v1593_v43, %v1589_v25 }
0x149f   :  { %2815 = vtanh.f32 %v1595_v26 }
0x14a9   :  { %v2816_v47 = vpop.eup %2815 }
0x14aa   :  { %v1597_v48 = vmul.f32 %v2816_v47, %v2814_v30 }
0x14ac   :  { %1601 = vrot.lane.b32.xlu1 %v1597_v48, %s2902_s27 }
0x151e   :  { %v1602_v49 = vpop.permute.xlu1 %1601 }
0x151f   :  { %2286 = vmatmul.mubr.msk.f32.vlgmr.msra.gmra.mrb[6].mxu1 %vm230_vm2, %v1602_v49 }
0x1520   :  { %2542 = vmatpush1.bf16.msra.mxu1 %v3271_v7  ;;  %1771 = vmatprep.mubr.f32.mxu1 %v2901_v3 }
0x1521   :  { %2544 = vmatprep.subr.bf16.mxu1 %v3273_v10 }
0x1524   :  { %2546 = vmatpush1.bf16.msra.mxu1 %v3289_v16 }
0x1525   :  { %2548 = vmatprep.subr.bf16.mxu1 %v3292_v17 }
0x1528   :  { %2550 = vmatpush1.bf16.msra.mxu1 %v3301_v22 }
0x1529   :  { %2552 = vmatprep.subr.bf16.mxu1 %v3314_v34 }
0x152c   :  { %2554 = vmatpush1.bf16.msra.mxu1 %v3319_v9 }
0x152d   :  { %2556 = vmatprep.subr.bf16.mxu1 %v3260_v2 }
0x15f2   :  { %v1671_v50 = vpop.f32.mrb[6].mxu1 }
0x15f3   :  { %v2637_v51 = vadd.f32 %v1671_v50, %v3343_v42  ;;  %v1673_v37 = vpop.f32.mrb[7].mxu1 }
0x15f4   :  { %v2638_v53 = vadd.f32 %v1673_v37, %v3348_v46 }
0x15f5   :  { %v2287_v52 = vmul.f32 -1.442695, %v2637_v51 }
0x15f6   :  { %v2288_v57 = vmul.f32 -1.442695, %v2638_v53 }
0x15f7   :  { %2817 = vpow2.f32 %v2287_v52 }
0x15f8   :  { %2819 = vtanh.f32 %v2638_v53 }
0x1601   :  { %v2818_v54 = vpop.eup %2817 }
0x1602   :  { %v1684_v55 = vadd.f32 1.0, %v2818_v54  ;;  %v2820_v56 = vpop.eup %2819 }
0x1604   :  { %2821 = vrcp.f32 %v1684_v55 }
0x1605   :  { %2823 = vpow2.f32 %v2288_v57 }
0x160e   :  { %v2822_v36 = vpop.eup %2821 }
0x160f   :  { %v1692_v44 = vmul.f32 %v2822_v36, %v2820_v56  ;;  %v2824_v58 = vpop.eup %2823  ;;  %v1691_v60 = vmul.f32 %v2822_v36, %v1595_v26 }
0x1610   :  { %v1685_v59 = vadd.f32 1.0, %v2824_v58 }
0x1611   :  { %1694 = vrot.lane.b32.xlu0 %v1692_v44, %s2902_s27 }
0x1612   :  { %2825 = vrcp.f32 %v1685_v59 }
0x161c   :  { %v2826_v63 = vpop.eup %2825 }
0x1683   :  { %v1695_v61 = vpop.permute.xlu0 %1694 }
0x1684   :  { %v1697_v62 = vadd.f32 %v1695_v61, %v1691_v60 }
0x1686   :  { %2827 = vtanh.f32 %v1697_v62 }
0x1690   :  { %v2828_v0 = vpop.eup %2827 }
0x1691   :  { %v1699_v1 = vmul.f32 %v2828_v0, %v2826_v63 }
0x1693   :  { %1703 = vrot.lane.b32.xlu1 %v1699_v1, %s2902_s27 }
0x1705   :  { %v1704_v39 = vpop.permute.xlu1 %1703 }
0x1706   :  { %2289 = vmatmul.mubr.msk.f32.vlgmr.msra.gmra.mrb[8].mxu1 %vm230_vm2, %v1704_v39 }
0x1707   :  { %2558 = vmatpush1.bf16.msra.mxu1 %v3271_v7  ;;  %1873 = vmatprep.mubr.f32.mxu1 %v2901_v3 }
0x1708   :  { %2560 = vmatprep.subr.bf16.mxu1 %v3273_v10 }
0x170b   :  { %2562 = vmatpush1.bf16.msra.mxu1 %v3289_v16 }
0x170c   :  { %2564 = vmatprep.subr.bf16.mxu1 %v3292_v17 }
0x170f   :  { %2566 = vmatpush1.bf16.msra.mxu1 %v3301_v22 }
0x1710   :  { %2568 = vmatprep.subr.bf16.mxu1 %v3314_v34 }
0x1713   :  { %2570 = vmatpush1.bf16.msra.mxu1 %v3319_v9 }
0x1714   :  { %2572 = vmatprep.subr.bf16.mxu1 %v3260_v2 }
0x17d9   :  { %v1773_v45 = vpop.f32.mrb[8].mxu1 }
0x17da   :  { %v2639_v4 = vadd.f32 %v1773_v45, %v3343_v42  ;;  %v1775_v5 = vpop.f32.mrb[9].mxu1 }
0x17db   :  { %v2640_v11 = vadd.f32 %v1775_v5, %v3348_v46 }
0x17dc   :  { %v2290_v6 = vmul.f32 -1.442695, %v2639_v4 }
0x17dd   :  { %v2291_v23 = vmul.f32 -1.442695, %v2640_v11 }
0x17de   :  { %2829 = vpow2.f32 %v2290_v6 }
0x17df   :  { %2831 = vtanh.f32 %v2640_v11 }
0x17e8   :  { %v2830_v12 = vpop.eup %2829 }
0x17e9   :  { %v1786_v13 = vadd.f32 1.0, %v2830_v12  ;;  %v2832_v15 = vpop.eup %2831 }
0x17eb   :  { %2833 = vrcp.f32 %v1786_v13 }
0x17ec   :  { %2835 = vpow2.f32 %v2291_v23  ;;  %v2903_v23 = vmov 0.0|0.0  }
0x17ed   :  { %2603 = vmatprep.subr.bf16.mxu0 %v2903_v23 }
0x17f5   :  { %v2834_v20 = vpop.eup %2833 }
0x17f6   :  { %v1794_v21 = vmul.f32 %v2834_v20, %v2832_v15  ;;  %v2836_v8 = vpop.eup %2835  ;;  %v1793_v27 = vmul.f32 %v2834_v20, %v1697_v62 }
0x17f7   :  { %v1787_v24 = vadd.f32 1.0, %v2836_v8 }
0x17f8   :  { %1796 = vrot.lane.b32.xlu0 %v1794_v21, %s2902_s27  ;;  %v2108_v21 = vld [vmem:[%s3487_s5] sm:$0xff] }
0x17f9   :  { %2837 = vrcp.f32 %v1787_v24  ;;  %v2111_v24 = vld [vmem:[%s3487_s5 + $0x18] sm:$0xff] }
0x1803   :  { %v2838_v31 = vpop.eup %2837 }
0x186a   :  { %v1797_v28 = vpop.permute.xlu0 %1796 }
0x186b   :  { %v1799_v29 = vadd.f32 %v1797_v28, %v1793_v27  ;;  %v2112_v28 = vld [vmem:[%s3487_s5 + $0x20] sm:$0xff] }
0x186d   :  { %2839 = vtanh.f32 %v1799_v29 }
0x1877   :  { %v2840_v32 = vpop.eup %2839 }
0x1878   :  { %v1801_v33 = vmul.f32 %v2840_v32, %v2838_v31  ;;  %v2114_v32 = vld [vmem:[%s3487_s5 + $0x30] sm:$0xff] }
0x187a   :  { %1805 = vrot.lane.b32.xlu1 %v1801_v33, %s2902_s27 }
0x18ec   :  { %v1806_v35 = vpop.permute.xlu1 %1805 }
0x18ed   :  { %2292 = vmatmul.mubr.msk.f32.vlgmr.msra.gmra.mrb[10].mxu1 %vm230_vm2, %v1806_v35 }
0x18ee   :  { %2574 = vmatpush1.bf16.msra.mxu1 %v3271_v7  ;;  %1975 = vmatprep.mubr.f32.mxu1 %v2901_v3 }
0x18ef   :  { %2576 = vmatprep.subr.bf16.mxu1 %v3273_v10 }
0x18f2   :  { %2578 = vmatpush1.bf16.msra.mxu1 %v3289_v16 }
0x18f3   :  { %2580 = vmatprep.subr.bf16.mxu1 %v3292_v17 }
0x18f6   :  { %2582 = vmatpush1.bf16.msra.mxu1 %v3301_v22 }
0x18f7   :  { %2584 = vmatprep.subr.bf16.mxu1 %v3314_v34 }
0x18fa   :  { %2586 = vmatpush1.bf16.msra.mxu1 %v3319_v9 }
0x18fb   :  { %2588 = vmatprep.subr.bf16.mxu1 %v3260_v2 }
0x19c0   :  { %v1875_v38 = vpop.f32.mrb[10].mxu1 }
0x19c1   :  { %v2641_v40 = vadd.f32 %v1875_v38, %v3343_v42  ;;  %v1877_v14 = vpop.f32.mrb[11].mxu1 }
0x19c2   :  { %v2642_v19 = vadd.f32 %v1877_v14, %v3348_v46 }
0x19c3   :  { %v2293_v18 = vmul.f32 -1.442695, %v2641_v40 }
0x19c4   :  { %v2294_v47 = vmul.f32 -1.442695, %v2642_v19 }
0x19c5   :  { %2841 = vpow2.f32 %v2293_v18 }
0x19c6   :  { %2843 = vtanh.f32 %v2642_v19 }
0x19cf   :  { %v2842_v41 = vpop.eup %2841 }
0x19d0   :  { %v1888_v25 = vadd.f32 1.0, %v2842_v41  ;;  %v2844_v43 = vpop.eup %2843 }
0x19d2   :  { %2845 = vrcp.f32 %v1888_v25 }
0x19d3   :  { %2847 = vpow2.f32 %v2294_v47 }
0x19dc   :  { %v2846_v26 = vpop.eup %2845 }
0x19dd   :  { %v1896_v30 = vmul.f32 %v2846_v26, %v2844_v43  ;;  %v2848_v2 = vpop.eup %2847  ;;  %v1895_v49 = vmul.f32 %v2846_v26, %v1799_v29  ;;  %v2113_v29 = vld [vmem:[%s3487_s5 + $0x28] sm:$0xff] }
0x19de   :  { %v1889_v48 = vadd.f32 1.0, %v2848_v2  ;;  %v2610_v31 = vpack.c.bf16 %v2113_v29, %v2112_v28 }
0x19df   :  { %1898 = vrot.lane.b32.xlu0 %v1896_v30, %s2902_s27  ;;  %v2301_v30 = vld [vmem:[%s3488_s6] ss:$0 sm:$0xff] }
0x19e0   :  { %2849 = vrcp.f32 %v1889_v48 }
0x19ea   :  { %v2850_v37 = vpop.eup %2849 }
0x1a51   :  { %v1899_v50 = vpop.permute.xlu0 %1898 }
0x1a52   :  { %v1901_v51 = vadd.f32 %v1899_v50, %v1895_v49 }
0x1a54   :  { %2851 = vtanh.f32 %v1901_v51 }
0x1a5e   :  { %v2852_v52 = vpop.eup %2851 }
0x1a5f   :  { %v1903_v53 = vmul.f32 %v2852_v52, %v2850_v37 }
0x1a61   :  { %1907 = vrot.lane.b32.xlu1 %v1903_v53, %s2902_s27 }
0x1ad3   :  { %v1908_v54 = vpop.permute.xlu1 %1907 }
0x1ad4   :  { %2295 = vmatmul.mubr.msk.f32.vlgmr.msra.gmra.mrb[12].mxu1 %vm230_vm2, %v1908_v54 }
0x1ad5   :  { %2590 = vmatpush1.bf16.msra.mxu1 %v3271_v7  ;;  %2077 = vmatprep.mubr.f32.mxu1 %v2901_v3  ;;  %v2115_v3 = vld [vmem:[%s3487_s5 + $0x38] sm:$0xff] }
0x1ad6   :  { %2592 = vmatprep.subr.bf16.mxu1 %v3273_v10  ;;  %v2613_v33 = vpack.c.bf16 %v2115_v3, %v2114_v32 }
0x1ad9   :  { %2594 = vmatpush1.bf16.msra.mxu1 %v3289_v16 }
0x1ada   :  { %2596 = vmatprep.subr.bf16.mxu1 %v3292_v17 }
0x1add   :  { %2598 = vmatpush1.bf16.msra.mxu1 %v3301_v22 }
0x1ade   :  { %2600 = vmatprep.subr.bf16.mxu1 %v3314_v34 }
0x1ae1   :  { %2602 = vmatpush1.bf16.msra.mxu1 %v3319_v9 }
0x1ba7   :  { %v1977_v55 = vpop.f32.mrb[12].mxu1 }
0x1ba8   :  { %v2643_v56 = vadd.f32 %v1977_v55, %v3343_v42  ;;  %v1979_v36 = vpop.f32.mrb[13].mxu1 }
0x1ba9   :  { %v2644_v7 = vadd.f32 %v1979_v36, %v3348_v46 }
0x1baa   :  { %v2296_v44 = vmul.f32 -1.442695, %v2643_v56 }
0x1bab   :  { %v2297_v22 = vmul.f32 -1.442695, %v2644_v7 }
0x1bac   :  { %2853 = vpow2.f32 %v2296_v44 }
0x1bad   :  { %2855 = vtanh.f32 %v2644_v7 }
0x1bb6   :  { %v2854_v57 = vpop.eup %2853 }
0x1bb7   :  { %v1990_v10 = vadd.f32 1.0, %v2854_v57  ;;  %v2856_v16 = vpop.eup %2855 }
0x1bb9   :  { %2857 = vrcp.f32 %v1990_v10 }
0x1bba   :  { %2859 = vpow2.f32 %v2297_v22 }
0x1bc3   :  { %v2858_v17 = vpop.eup %2857 }
0x1bc4   :  { %v1998_v58 = vmul.f32 %v2858_v17, %v2856_v16  ;;  %v2860_v34 = vpop.eup %2859  ;;  %v1997_v59 = vmul.f32 %v2858_v17, %v1901_v51 }
0x1bc5   :  { %v1991_v9 = vadd.f32 1.0, %v2860_v34 }
0x1bc6   :  { %2000 = vrot.lane.b32.xlu0 %v1998_v58, %s2902_s27 }
0x1bc7   :  { %2861 = vrcp.f32 %v1991_v9 }
0x1bd1   :  { %v2862_v62 = vpop.eup %2861 }
0x1c38   :  { %v2001_v60 = vpop.permute.xlu0 %2000 }
0x1c39   :  { %v2003_v61 = vadd.f32 %v2001_v60, %v1997_v59 }
0x1c3b   :  { %2863 = vtanh.f32 %v2003_v61 }
0x1c45   :  { %v2864_v63 = vpop.eup %2863 }
0x1c46   :  { %v2005_v0 = vmul.f32 %v2864_v63, %v2862_v62 }
0x1c48   :  { %2009 = vrot.lane.b32.xlu1 %v2005_v0, %s2902_s27 }
0x1cba   :  { %v2010_v1 = vpop.permute.xlu1 %2009 }
0x1cbb   :  { %2298 = vmatmul.mubr.msk.f32.vlgmr.msra.gmra.mrb[14].mxu1 %vm230_vm2, %v2010_v1 }
0x1d8e   :  { %v2079_v39 = vpop.f32.mrb[14].mxu1 }
0x1d8f   :  { %v2645_v45 = vadd.f32 %v2079_v39, %v3343_v42  ;;  %v2081_v4 = vpop.f32.mrb[15].mxu1  ;;  %v2109_v42 = vld [vmem:[%s3487_s5 + $0x8] sm:$0xff] }
0x1d90   :  { %v2646_v6 = vadd.f32 %v2081_v4, %v3348_v46  ;;  %v2110_v46 = vld [vmem:[%s3487_s5 + $0x10] sm:$0xff]  ;;  %v2604_v8 = vpack.c.bf16 %v2109_v42, %v2108_v21 }
0x1d91   :  { %v2299_v5 = vmul.f32 -1.442695, %v2645_v45  ;;  %v2607_v27 = vpack.c.bf16 %v2111_v24, %v2110_v46 }
0x1d92   :  { %2605 = vmatpush3.bf16.msra.mxu0 %v2604_v8  ;;  %v2300_v35 = vmul.f32 -1.442695, %v2646_v6 }
0x1d93   :  { %2865 = vpow2.f32 %v2299_v5  ;;  %2606 = vmatprep.subr.bf16.mxu0 %v2903_v23 }
0x1d94   :  { %2867 = vtanh.f32 %v2646_v6 }
0x1d96   :  { %2608 = vmatpush3.bf16.msra.mxu0 %v2607_v27 }
0x1d97   :  { %2609 = vmatprep.subr.bf16.mxu0 %v2903_v23 }
0x1d9a   :  { %2611 = vmatpush3.bf16.msra.mxu0 %v2610_v31 }
0x1d9b   :  { %2612 = vmatprep.subr.bf16.mxu0 %v2903_v23 }
0x1d9d   :  { %v2866_v11 = vpop.eup %2865 }
0x1d9e   :  { %v2092_v12 = vadd.f32 1.0, %v2866_v11  ;;  %v2868_v13 = vpop.eup %2867  ;;  %2614 = vmatpush3.bf16.msra.mxu0 %v2613_v33 }
0x1da0   :  { %2869 = vrcp.f32 %v2092_v12 }
0x1da1   :  { %2871 = vpow2.f32 %v2300_v35 }
0x1daa   :  { %v2870_v15 = vpop.eup %2869 }
0x1dab   :  { %v2100_v20 = vmul.f32 %v2870_v15, %v2868_v13  ;;  %v2872_v38 = vpop.eup %2871  ;;  %v2099_v14 = vmul.f32 %v2870_v15, %v2003_v61 }
0x1dac   :  { %v2093_v40 = vadd.f32 1.0, %v2872_v38 }
0x1dad   :  { %2102 = vrot.lane.b32.xlu0 %v2100_v20, %s2902_s27 }
0x1dae   :  { %2873 = vrcp.f32 %v2093_v40 }
0x1db8   :  { %v2874_v41 = vpop.eup %2873 }
0x1e1f   :  { %v2103_v18 = vpop.permute.xlu0 %2102 }
0x1e20   :  { %v2105_v19 = vadd.f32 %v2103_v18, %v2099_v14 }
0x1e22   :  { %2875 = vtanh.f32 %v2105_v19 }
0x1e2c   :  { %v2876_v25 = vpop.eup %2875 }
0x1e2d   :  { %v2107_v43 = vmul.f32 %v2876_v25, %v2874_v41 }
0x1e2f   :  { %2124 = vrot.lane.b32.xlu1 %v2107_v43, %s2902_s27 }
0x1ea1   :  { %v2125_v26 = vpop.permute.xlu1 %2124 }
0x1ea2   :  { %2329 = vmatmul.mubr.msk.f32.vlgmr.msra.gmra.mrb[16].mxu0 %vm230_vm2, %v2125_v26 }
0x1f75   :  { %v2194_v47 = vpop.f32.mrb[16].mxu0 }
0x1f76   :  { %v2195_v2 = vadd.f32 %v2301_v30, %v2194_v47  ;;  %v2330_v48 = vpop.f32.mrb[17].mxu0 }
0x1f78   :  { %2198 = vst [vmem:[#allocation4] sm:$0xff] %v2195_v2 }
0x1f79   :  { %2888 = shalt.err (!%p2885_p4)
}
0x1f7a   :  { %s2889_s14 = scalar_lea.hbm %s3489_s7, 128 }
0x1f7b   :  { %p2890_p5 = scmp.ne.s32.totalorder %s3489_s7, %s2889_s14  ;;  %p2893_p6 = scmp.lt.u32.totalorder %s2889_s14, %s3489_s7 }
0x1f7d   :  { %p2895_p7 = pnand %p2893_p6, %p2890_p5 }
0x1f7f   :  { %2898 = shalt.err (!%p2895_p7)
}
0x1f80   :  { %2208 = dma.vmem_to_hbm [thread:$0]  %s2206_s2, 128, %s3489_s7, [#allocation5]  }
0x1f81   :  { %2899 = dma.done.wait [#allocation5], 128  }
0x1f82   :  { %2900 = vsyncadd [#allocation5], 4294967168 }
0x1f83   :  { %2212 = vsyncpa [#allocation5], 1 }

</bundles_post_ra>
